<compile_context>
chip_gen: v5e
topology: v5e:2x2
jax: 0.10.0
libtpu: 0.0.40
codegen_flags: <defaults>
</compile_context>

<pallas_src>
import jax
import jax.numpy as jnp
from jax.experimental import pallas as pl
from jax.experimental.pallas import tpu as pltpu


def _round_up(x, m):
    return ((x + m - 1) // m) * m


# ---------------------------------------------------------------------------
# Kernel
# ---------------------------------------------------------------------------
def sst_kernel(x_ref, wih_f_ref, b_f_ref, wih_r_ref, whh_r_ref, b_r_ref,
               wof_ref, wor_ref, b_out_ref, out_ref):
    T, Bt, E = x_ref.shape
    H = whh_r_ref.shape[0]

    wih_f = wih_f_ref[...]            # (E, 4H)  bf16, gate order (i, f, o, g)
    b_f = b_f_ref[...]                # (1, 4H)  f32
    wih_r = wih_r_ref[...]            # (E, 4H)  bf16
    whh_r = whh_r_ref[...]            # (H, 4H)  bf16
    b_r = b_r_ref[...]                # (1, 4H)  f32

    x = x_ref[...]                    # (T, Bt, E) bf16

    def gate_act(gates):
        """gates: (rows, 4H) f32, columns permuted to (i, f, o, g)."""
        if 4 * H <= 128:
            # tiny H: 4H fits a single vreg row -> two full-width EUP pushes
            sg = jax.nn.sigmoid(gates)
            tg = jnp.tanh(gates)
            return (sg[:, 0:H], sg[:, H:2 * H], sg[:, 2 * H:3 * H],
                    tg[:, 3 * H:4 * H])
        # larger H: sigmoid only over the contiguous (i, f, o) block, tanh
        # only over g -> 4H lanes of EUP work per row instead of 8H.
        sg = jax.nn.sigmoid(gates[:, 0:3 * H])
        g = jnp.tanh(gates[:, 3 * H:4 * H])
        return sg[:, 0:H], sg[:, H:2 * H], sg[:, 2 * H:3 * H], g

    # ---- hoisted time-invariant input projection (ONE matmul) -------------
    # rows [t*Bt, (t+1)*Bt) hold the reverse-direction input gates at time t.
    gates_x_r = (jnp.dot(x.reshape(T * Bt, E), wih_r,
                         preferred_element_type=jnp.float32)
                 + b_r)                                        # (T*Bt, 4H) f32

    # ---- forward direction: only t = 0 is consumed, h0 = c0 = 0 -----------
    gates_f0 = (jnp.dot(x[0], wih_f, preferred_element_type=jnp.float32)
                + b_f)                                         # (Bt, 4H) f32
    i, _, o, g = gate_act(gates_f0)
    c_f = i * g                        # f * c0 dropped (c0 = 0)
    h_f = o * jnp.tanh(c_f)

    # ---- backward direction: x[T-1] ... x[0] -------------------------------
    # peeled first step uses the zero initial state -> no recurrent matmul
    i, _, o, g = gate_act(gates_x_r[(T - 1) * Bt:T * Bt, :])
    c = i * g
    h = o * jnp.tanh(c)

    # remaining T-1 steps, fully unrolled (T static & small), static slices
    # of the hoisted projection (Bt is a multiple of 16 -> sublane aligned).
    # TODO(synk): for long T switch to lax.fori_loop over a VMEM-resident
    # gates_x_r scratch (pl.ds + pl.multiple_of) to bound live ranges.
    for t in range(T - 2, -1, -1):
        gates = (gates_x_r[t * Bt:(t + 1) * Bt, :]
                 + jnp.dot(h.astype(whh_r.dtype), whh_r,
                           preferred_element_type=jnp.float32))
        i, f, o, g = gate_act(gates)
        c = f * c + i * g
        h = o * jnp.tanh(c)

    # ---- classifier head: concat+dot -> two dots, lane-dense 128-wide out --
    logits = (jnp.dot(h_f, wof_ref[...], preferred_element_type=jnp.float32)
              + jnp.dot(h, wor_ref[...], preferred_element_type=jnp.float32)
              + b_out_ref[...])                                 # (Bt, 128) f32
    # padded class lanes carry a ~-1e30 bias (zero weight columns), so their
    # exp() underflows to 0 and log_softmax over the full 128-lane tile equals
    # log_softmax over the 2 real classes (matches F.log_softmax dim=1).
    z = logits - jnp.max(logits, axis=-1, keepdims=True)
    out_ref[...] = z - jnp.log(jnp.sum(jnp.exp(z), axis=-1, keepdims=True))


# ---------------------------------------------------------------------------
# Parameters
# ---------------------------------------------------------------------------
def init_params(key, embedding_dim, hidden_dim):
    """PyTorch-layout parameters (same init distribution as nn.LSTM/Linear)."""
    E, H = embedding_dim, hidden_dim
    ks = jax.random.split(key, 12)
    s_lstm = 1.0 / jnp.sqrt(jnp.float32(H))
    s_lin = 1.0 / jnp.sqrt(jnp.float32(2 * H))

    def u(k, shape, s):
        return jax.random.uniform(k, shape, jnp.float32, -s, s)

    p = {}
    # forward direction (w_hh_f exists in the module but is unused because
    # only the zero-state first step of the forward direction is consumed)
    p["w_ih_f"] = u(ks[0], (4 * H, E), s_lstm)
    p["w_hh_f"] = u(ks[1], (4 * H, H), s_lstm)
    p["b_f"] = u(ks[2], (4 * H,), s_lstm) + u(ks[3], (4 * H,), s_lstm)
    # reverse direction
    p["w_ih_r"] = u(ks[4], (4 * H, E), s_lstm)
    p["w_hh_r"] = u(ks[5], (4 * H, H), s_lstm)
    p["b_r"] = u(ks[6], (4 * H,), s_lstm) + u(ks[7], (4 * H,), s_lstm)
    # hidden_2_sig linear: (2, 2H) weight, (2,) bias
    p["w_out"] = u(ks[8], (2, 2 * H), s_lin)
    p["b_out"] = u(ks[9], (2,), s_lin)
    return p
    # TODO(synk): nn.Embedding / nn.Dropout exist in __init__ but are not used
    # in forward(), so they are intentionally not materialized here.


def pack_params(params, *, padded_classes=128, neg_inf=-1e30):
    """One-time layout/dtype conversion to the kernel's expected layout."""
    H = params["w_hh_r"].shape[1]
    E = params["w_ih_f"].shape[1]
    E_pad = _round_up(E, 128)
    NC = padded_classes

    def perm_ifog(w):
        # PyTorch gate order along axis 0 is (i, f, g, o); kernel wants
        # (i, f, o, g) so sigmoid can run on a contiguous [:, :3H] block.
        i, f, g, o = jnp.split(w, 4, axis=0)
        return jnp.concatenate([i, f, o, g], axis=0)

    def pack_ih(w):                   # (4H, E) -> (E_pad, 4H) bf16 (zero rows)
        wt = perm_ifog(w).T
        return jnp.pad(wt, ((0, E_pad - E), (0, 0))).astype(jnp.bfloat16)

    def pack_head(w_half):            # (2, H) -> (H, NC) f32, zero columns
        return jnp.pad(w_half.T, ((0, 0), (0, NC - 2))).astype(jnp.float32)

    b_out = jnp.full((1, NC), neg_inf, jnp.float32)
    b_out = b_out.at[0, :2].set(params["b_out"].astype(jnp.float32))

    return dict(
        wih_f=pack_ih(params["w_ih_f"]),                           # (E_pad,4H)
        b_f=perm_ifog(params["b_f"]).reshape(1, 4 * H).astype(jnp.float32),
        wih_r=pack_ih(params["w_ih_r"]),                           # (E_pad,4H)
        whh_r=perm_ifog(params["w_hh_r"]).T.astype(jnp.bfloat16),  # (H, 4H)
        b_r=perm_ifog(params["b_r"]).reshape(1, 4 * H).astype(jnp.float32),
        w_out_f=pack_head(params["w_out"][:, :H]),                 # (H, NC)
        w_out_r=pack_head(params["w_out"][:, H:]),                 # (H, NC)
        b_out=b_out,                                               # (1, NC)
    )


# ---------------------------------------------------------------------------
# Wrapper
# ---------------------------------------------------------------------------
def _vmem_footprint(tb, T, E_pad, H):
    """Rough per-grid-step VMEM bytes (double-buffered x + in-kernel values)."""
    H4 = _round_up(4 * H, 128)
    x_tile = 2 * T * tb * E_pad * 2          # x block, double-buffered, bf16
    gates = T * tb * H4 * 4                  # hoisted projection, f32
    work = 8 * tb * H4 * 4                   # gate / state working set, f32
    out = 2 * tb * 128 * 4                   # lane-dense output block
    return x_tile + gates + work + out


def _choose_batch_tile(B, T, E_pad, H):
    """128-256 row tiles; >=2 grid steps on larger batches so v7x's two
    TensorCores can both work the 'parallel' axis; clamp to a VMEM budget
    (v7x has 64 MiB physical VMEM vs 128 MiB on v5e/v6e)."""
    B16 = _round_up(B, 16)
    if B16 <= 32:
        tb = B16                                         # tiny batch: one step
    else:
        tb = min(256, _round_up(pl.cdiv(B16, 2), 16))    # grid >= 2
    budget = 24 * 1024 * 1024
    while tb > 16 and _vmem_footprint(tb, T, E_pad, H) > budget:
        tb = _round_up(tb // 2, 16)
    return tb


def sst_forward(embeds, packed, *, batch_tile=None):
    B, T, E = embeds.shape
    H = packed["whh_r"].shape[0]
    E_pad = packed["wih_f"].shape[0]
    NC = packed["b_out"].shape[1]

    tb = batch_tile if batch_tile is not None else _choose_batch_tile(
        B, T, E_pad, H)
    B_pad = pl.cdiv(B, tb) * tb

    fp = _vmem_footprint(tb, T, E_pad, H)
    vmem_limit = int(min(max(4 * fp + (4 << 20), 16 << 20), 48 << 20))

    # time-major, bf16 MXU operand; batch padded to the tile, E zero-padded
    # to a lane-aligned multiple of 128 (matches the zero-padded w_ih rows).
    x = jnp.transpose(embeds, (1, 0, 2)).astype(jnp.bfloat16)    # (T, B, E)
    x = jnp.pad(x, ((0, 0), (0, B_pad - B), (0, E_pad - E)))

    def full(shape):
        n = len(shape)
        return pl.BlockSpec(shape, lambda b, _n=n: (0,) * _n)

    out = pl.pallas_call(
        sst_kernel,
        out_shape=jax.ShapeDtypeStruct((B_pad, NC), jnp.float32),
        grid_spec=pltpu.PrefetchScalarGridSpec(
            num_scalar_prefetch=0,
            grid=(B_pad // tb,),
            in_specs=[
                pl.BlockSpec((T, tb, E_pad), lambda b: (0, b, 0)),  # x tile
                full(packed["wih_f"].shape),
                full(packed["b_f"].shape),
                full(packed["wih_r"].shape),
                full(packed["whh_r"].shape),
                full(packed["b_r"].shape),
                full(packed["w_out_f"].shape),
                full(packed["w_out_r"].shape),
                full(packed["b_out"].shape),
            ],
            out_specs=pl.BlockSpec((tb, NC), lambda b: (b, 0)),
        ),
        compiler_params=pltpu.CompilerParams(
            dimension_semantics=("parallel",),
            vmem_limit_bytes=vmem_limit),
    )(x, packed["wih_f"], packed["b_f"], packed["wih_r"], packed["whh_r"],
      packed["b_r"], packed["w_out_f"], packed["w_out_r"], packed["b_out"])
    return out[:B, :2]


if __name__ == "__main__":
    B, T, E, H = 2, 8, 32, 32
    key = jax.random.PRNGKey(0)
    k_x, k_p = jax.random.split(key)

    embeds = jax.random.normal(k_x, (B, T, E), jnp.float32)  # (batch, seq, emb)
    params = init_params(k_p, E, H)
    packed = pack_params(params)     # one-time weight permute/transpose/cast

    out = jax.block_until_ready(sst_forward(embeds, packed))

    assert out.shape == (B, 2)
    # rows of log_softmax must exp-sum to 1
    assert bool(jnp.allclose(jnp.exp(out).sum(axis=-1), 1.0, atol=1e-4))
    print("KERNEL_OK")
</pallas_src>

<mosaic_0001>
module attributes {stable_mosaic.version = 11 : i64} {
  func.func @sst_kernel(%arg0: i32, %arg1: memref<8x16x128xbf16, #tpu.memory_space<vmem>>, %arg2: memref<128x128xbf16, #tpu.memory_space<vmem>>, %arg3: memref<1x128xf32, #tpu.memory_space<vmem>>, %arg4: memref<128x128xbf16, #tpu.memory_space<vmem>>, %arg5: memref<32x128xbf16, #tpu.memory_space<vmem>>, %arg6: memref<1x128xf32, #tpu.memory_space<vmem>>, %arg7: memref<32x128xf32, #tpu.memory_space<vmem>>, %arg8: memref<32x128xf32, #tpu.memory_space<vmem>>, %arg9: memref<1x128xf32, #tpu.memory_space<vmem>>, %arg10: memref<16x128xf32, #tpu.memory_space<vmem>>) attributes {dimension_semantics = [#tpu.dimension_semantics<parallel>], iteration_bounds = array<i64: 1>, scalar_prefetch = 0 : i64, scratch_operands = 0 : i64, tpu.core_type = #tpu.core_type<tc>, window_params = [{transform_indices = @transform_0, window_bounds = array<i64: 8, 16, 128>}, {pipeline_mode = #tpu.pipeline_mode<synchronous>, transform_indices = @transform_1, window_bounds = array<i64: 128, 128>}, {pipeline_mode = #tpu.pipeline_mode<synchronous>, transform_indices = @transform_2, window_bounds = array<i64: 1, 128>}, {pipeline_mode = #tpu.pipeline_mode<synchronous>, transform_indices = @transform_3, window_bounds = array<i64: 128, 128>}, {pipeline_mode = #tpu.pipeline_mode<synchronous>, transform_indices = @transform_4, window_bounds = array<i64: 32, 128>}, {pipeline_mode = #tpu.pipeline_mode<synchronous>, transform_indices = @transform_5, window_bounds = array<i64: 1, 128>}, {pipeline_mode = #tpu.pipeline_mode<synchronous>, transform_indices = @transform_6, window_bounds = array<i64: 32, 128>}, {pipeline_mode = #tpu.pipeline_mode<synchronous>, transform_indices = @transform_7, window_bounds = array<i64: 32, 128>}, {pipeline_mode = #tpu.pipeline_mode<synchronous>, transform_indices = @transform_8, window_bounds = array<i64: 1, 128>}, {transform_indices = @transform_9, window_bounds = array<i64: 16, 128>}]} {
    %c0 = arith.constant 0 : index
    %c0_0 = arith.constant 0 : index
    %0 = vector.load %arg2[%c0, %c0_0] : memref<128x128xbf16, #tpu.memory_space<vmem>>, vector<128x128xbf16>
    %c0_1 = arith.constant 0 : index
    %c0_2 = arith.constant 0 : index
    %1 = vector.load %arg3[%c0_1, %c0_2] : memref<1x128xf32, #tpu.memory_space<vmem>>, vector<1x128xf32>
    %c0_3 = arith.constant 0 : index
    %c0_4 = arith.constant 0 : index
    %2 = vector.load %arg4[%c0_3, %c0_4] : memref<128x128xbf16, #tpu.memory_space<vmem>>, vector<128x128xbf16>
    %c0_5 = arith.constant 0 : index
    %c0_6 = arith.constant 0 : index
    %3 = vector.load %arg5[%c0_5, %c0_6] : memref<32x128xbf16, #tpu.memory_space<vmem>>, vector<32x128xbf16>
    %c0_7 = arith.constant 0 : index
    %c0_8 = arith.constant 0 : index
    %4 = vector.load %arg6[%c0_7, %c0_8] : memref<1x128xf32, #tpu.memory_space<vmem>>, vector<1x128xf32>
    %c0_9 = arith.constant 0 : index
    %c0_10 = arith.constant 0 : index
    %c0_11 = arith.constant 0 : index
    %5 = vector.load %arg1[%c0_9, %c0_10, %c0_11] : memref<8x16x128xbf16, #tpu.memory_space<vmem>>, vector<8x16x128xbf16>
    %6 = vector.shape_cast %5 : vector<8x16x128xbf16> to vector<128x128xbf16>
    %cst = arith.constant dense<0.000000e+00> : vector<128x128xf32>
    %7 = tpu.matmul %6, %2, %cst {dimension_numbers = #tpu.dot_dimension_numbers<[1], [0], [0], [1], [0, 0, 1, 1], [], []>} : vector<128x128xbf16>, vector<128x128xbf16>, vector<128x128xf32> -> vector<128x128xf32>
    %8 = vector.broadcast %4 : vector<1x128xf32> to vector<128x128xf32>
    %9 = arith.addf %7, %8 : vector<128x128xf32>
    %10 = vector.extract_strided_slice %5 {offsets = [0, 0, 0], sizes = [1, 16, 128], strides = [1, 1, 1]} : vector<8x16x128xbf16> to vector<1x16x128xbf16>
    %11 = vector.shape_cast %10 : vector<1x16x128xbf16> to vector<16x128xbf16>
    %cst_12 = arith.constant dense<0.000000e+00> : vector<16x128xf32>
    %12 = tpu.matmul %11, %0, %cst_12 {dimension_numbers = #tpu.dot_dimension_numbers<[1], [0], [0], [1], [0, 0, 1, 1], [], []>} : vector<16x128xbf16>, vector<128x128xbf16>, vector<16x128xf32> -> vector<16x128xf32>
    %13 = vector.broadcast %1 : vector<1x128xf32> to vector<16x128xf32>
    %14 = arith.addf %12, %13 : vector<16x128xf32>
    %15 = arith.negf %14 : vector<16x128xf32>
    %16 = math.exp %15 : vector<16x128xf32>
    %cst_13 = arith.constant 1.000000e+00 : f32
    %17 = vector.broadcast %cst_13 : f32 to vector<16x128xf32>
    %18 = arith.addf %17, %16 : vector<16x128xf32>
    %19 = arith.divf %17, %18 : vector<16x128xf32>
    %20 = math.tanh %14 : vector<16x128xf32>
    %21 = vector.extract_strided_slice %19 {offsets = [0, 0], sizes = [16, 32], strides = [1, 1]} : vector<16x128xf32> to vector<16x32xf32>
    %22 = vector.extract_strided_slice %19 {offsets = [0, 64], sizes = [16, 32], strides = [1, 1]} : vector<16x128xf32> to vector<16x32xf32>
    %23 = vector.extract_strided_slice %20 {offsets = [0, 96], sizes = [16, 32], strides = [1, 1]} : vector<16x128xf32> to vector<16x32xf32>
    %24 = arith.mulf %21, %23 : vector<16x32xf32>
    %25 = math.tanh %24 : vector<16x32xf32>
    %26 = arith.mulf %22, %25 : vector<16x32xf32>
    %27 = vector.extract_strided_slice %9 {offsets = [112, 0], sizes = [16, 128], strides = [1, 1]} : vector<128x128xf32> to vector<16x128xf32>
    %28 = arith.negf %27 : vector<16x128xf32>
    %29 = math.exp %28 : vector<16x128xf32>
    %cst_14 = arith.constant 1.000000e+00 : f32
    %30 = vector.broadcast %cst_14 : f32 to vector<16x128xf32>
    %31 = arith.addf %30, %29 : vector<16x128xf32>
    %32 = arith.divf %30, %31 : vector<16x128xf32>
    %33 = math.tanh %27 : vector<16x128xf32>
    %34 = vector.extract_strided_slice %32 {offsets = [0, 0], sizes = [16, 32], strides = [1, 1]} : vector<16x128xf32> to vector<16x32xf32>
    %35 = vector.extract_strided_slice %32 {offsets = [0, 64], sizes = [16, 32], strides = [1, 1]} : vector<16x128xf32> to vector<16x32xf32>
    %36 = vector.extract_strided_slice %33 {offsets = [0, 96], sizes = [16, 32], strides = [1, 1]} : vector<16x128xf32> to vector<16x32xf32>
    %37 = arith.mulf %34, %36 : vector<16x32xf32>
    %38 = math.tanh %37 : vector<16x32xf32>
    %39 = arith.mulf %35, %38 : vector<16x32xf32>
    %40 = vector.extract_strided_slice %9 {offsets = [96, 0], sizes = [16, 128], strides = [1, 1]} : vector<128x128xf32> to vector<16x128xf32>
    %41 = arith.truncf %39 : vector<16x32xf32> to vector<16x32xbf16>
    %cst_15 = arith.constant dense<0.000000e+00> : vector<16x128xf32>
    %42 = tpu.matmul %41, %3, %cst_15 {dimension_numbers = #tpu.dot_dimension_numbers<[1], [0], [0], [1], [0, 0, 1, 1], [], []>} : vector<16x32xbf16>, vector<32x128xbf16>, vector<16x128xf32> -> vector<16x128xf32>
    %43 = arith.addf %40, %42 : vector<16x128xf32>
    %44 = arith.negf %43 : vector<16x128xf32>
    %45 = math.exp %44 : vector<16x128xf32>
    %cst_16 = arith.constant 1.000000e+00 : f32
    %46 = vector.broadcast %cst_16 : f32 to vector<16x128xf32>
    %47 = arith.addf %46, %45 : vector<16x128xf32>
    %48 = arith.divf %46, %47 : vector<16x128xf32>
    %49 = math.tanh %43 : vector<16x128xf32>
    %50 = vector.extract_strided_slice %48 {offsets = [0, 0], sizes = [16, 32], strides = [1, 1]} : vector<16x128xf32> to vector<16x32xf32>
    %51 = vector.extract_strided_slice %48 {offsets = [0, 32], sizes = [16, 32], strides = [1, 1]} : vector<16x128xf32> to vector<16x32xf32>
    %52 = vector.extract_strided_slice %48 {offsets = [0, 64], sizes = [16, 32], strides = [1, 1]} : vector<16x128xf32> to vector<16x32xf32>
    %53 = vector.extract_strided_slice %49 {offsets = [0, 96], sizes = [16, 32], strides = [1, 1]} : vector<16x128xf32> to vector<16x32xf32>
    %54 = arith.mulf %51, %37 : vector<16x32xf32>
    %55 = arith.mulf %50, %53 : vector<16x32xf32>
    %56 = arith.addf %54, %55 : vector<16x32xf32>
    %57 = math.tanh %56 : vector<16x32xf32>
    %58 = arith.mulf %52, %57 : vector<16x32xf32>
    %59 = vector.extract_strided_slice %9 {offsets = [80, 0], sizes = [16, 128], strides = [1, 1]} : vector<128x128xf32> to vector<16x128xf32>
    %60 = arith.truncf %58 : vector<16x32xf32> to vector<16x32xbf16>
    %cst_17 = arith.constant dense<0.000000e+00> : vector<16x128xf32>
    %61 = tpu.matmul %60, %3, %cst_17 {dimension_numbers = #tpu.dot_dimension_numbers<[1], [0], [0], [1], [0, 0, 1, 1], [], []>} : vector<16x32xbf16>, vector<32x128xbf16>, vector<16x128xf32> -> vector<16x128xf32>
    %62 = arith.addf %59, %61 : vector<16x128xf32>
    %63 = arith.negf %62 : vector<16x128xf32>
    %64 = math.exp %63 : vector<16x128xf32>
    %cst_18 = arith.constant 1.000000e+00 : f32
    %65 = vector.broadcast %cst_18 : f32 to vector<16x128xf32>
    %66 = arith.addf %65, %64 : vector<16x128xf32>
    %67 = arith.divf %65, %66 : vector<16x128xf32>
    %68 = math.tanh %62 : vector<16x128xf32>
    %69 = vector.extract_strided_slice %67 {offsets = [0, 0], sizes = [16, 32], strides = [1, 1]} : vector<16x128xf32> to vector<16x32xf32>
    %70 = vector.extract_strided_slice %67 {offsets = [0, 32], sizes = [16, 32], strides = [1, 1]} : vector<16x128xf32> to vector<16x32xf32>
    %71 = vector.extract_strided_slice %67 {offsets = [0, 64], sizes = [16, 32], strides = [1, 1]} : vector<16x128xf32> to vector<16x32xf32>
    %72 = vector.extract_strided_slice %68 {offsets = [0, 96], sizes = [16, 32], strides = [1, 1]} : vector<16x128xf32> to vector<16x32xf32>
    %73 = arith.mulf %70, %56 : vector<16x32xf32>
    %74 = arith.mulf %69, %72 : vector<16x32xf32>
    %75 = arith.addf %73, %74 : vector<16x32xf32>
    %76 = math.tanh %75 : vector<16x32xf32>
    %77 = arith.mulf %71, %76 : vector<16x32xf32>
    %78 = vector.extract_strided_slice %9 {offsets = [64, 0], sizes = [16, 128], strides = [1, 1]} : vector<128x128xf32> to vector<16x128xf32>
    %79 = arith.truncf %77 : vector<16x32xf32> to vector<16x32xbf16>
    %cst_19 = arith.constant dense<0.000000e+00> : vector<16x128xf32>
    %80 = tpu.matmul %79, %3, %cst_19 {dimension_numbers = #tpu.dot_dimension_numbers<[1], [0], [0], [1], [0, 0, 1, 1], [], []>} : vector<16x32xbf16>, vector<32x128xbf16>, vector<16x128xf32> -> vector<16x128xf32>
    %81 = arith.addf %78, %80 : vector<16x128xf32>
    %82 = arith.negf %81 : vector<16x128xf32>
    %83 = math.exp %82 : vector<16x128xf32>
    %cst_20 = arith.constant 1.000000e+00 : f32
    %84 = vector.broadcast %cst_20 : f32 to vector<16x128xf32>
    %85 = arith.addf %84, %83 : vector<16x128xf32>
    %86 = arith.divf %84, %85 : vector<16x128xf32>
    %87 = math.tanh %81 : vector<16x128xf32>
    %88 = vector.extract_strided_slice %86 {offsets = [0, 0], sizes = [16, 32], strides = [1, 1]} : vector<16x128xf32> to vector<16x32xf32>
    %89 = vector.extract_strided_slice %86 {offsets = [0, 32], sizes = [16, 32], strides = [1, 1]} : vector<16x128xf32> to vector<16x32xf32>
    %90 = vector.extract_strided_slice %86 {offsets = [0, 64], sizes = [16, 32], strides = [1, 1]} : vector<16x128xf32> to vector<16x32xf32>
    %91 = vector.extract_strided_slice %87 {offsets = [0, 96], sizes = [16, 32], strides = [1, 1]} : vector<16x128xf32> to vector<16x32xf32>
    %92 = arith.mulf %89, %75 : vector<16x32xf32>
    %93 = arith.mulf %88, %91 : vector<16x32xf32>
    %94 = arith.addf %92, %93 : vector<16x32xf32>
    %95 = math.tanh %94 : vector<16x32xf32>
    %96 = arith.mulf %90, %95 : vector<16x32xf32>
    %97 = vector.extract_strided_slice %9 {offsets = [48, 0], sizes = [16, 128], strides = [1, 1]} : vector<128x128xf32> to vector<16x128xf32>
    %98 = arith.truncf %96 : vector<16x32xf32> to vector<16x32xbf16>
    %cst_21 = arith.constant dense<0.000000e+00> : vector<16x128xf32>
    %99 = tpu.matmul %98, %3, %cst_21 {dimension_numbers = #tpu.dot_dimension_numbers<[1], [0], [0], [1], [0, 0, 1, 1], [], []>} : vector<16x32xbf16>, vector<32x128xbf16>, vector<16x128xf32> -> vector<16x128xf32>
    %100 = arith.addf %97, %99 : vector<16x128xf32>
    %101 = arith.negf %100 : vector<16x128xf32>
    %102 = math.exp %101 : vector<16x128xf32>
    %cst_22 = arith.constant 1.000000e+00 : f32
    %103 = vector.broadcast %cst_22 : f32 to vector<16x128xf32>
    %104 = arith.addf %103, %102 : vector<16x128xf32>
    %105 = arith.divf %103, %104 : vector<16x128xf32>
    %106 = math.tanh %100 : vector<16x128xf32>
    %107 = vector.extract_strided_slice %105 {offsets = [0, 0], sizes = [16, 32], strides = [1, 1]} : vector<16x128xf32> to vector<16x32xf32>
    %108 = vector.extract_strided_slice %105 {offsets = [0, 32], sizes = [16, 32], strides = [1, 1]} : vector<16x128xf32> to vector<16x32xf32>
    %109 = vector.extract_strided_slice %105 {offsets = [0, 64], sizes = [16, 32], strides = [1, 1]} : vector<16x128xf32> to vector<16x32xf32>
    %110 = vector.extract_strided_slice %106 {offsets = [0, 96], sizes = [16, 32], strides = [1, 1]} : vector<16x128xf32> to vector<16x32xf32>
    %111 = arith.mulf %108, %94 : vector<16x32xf32>
    %112 = arith.mulf %107, %110 : vector<16x32xf32>
    %113 = arith.addf %111, %112 : vector<16x32xf32>
    %114 = math.tanh %113 : vector<16x32xf32>
    %115 = arith.mulf %109, %114 : vector<16x32xf32>
    %116 = vector.extract_strided_slice %9 {offsets = [32, 0], sizes = [16, 128], strides = [1, 1]} : vector<128x128xf32> to vector<16x128xf32>
    %117 = arith.truncf %115 : vector<16x32xf32> to vector<16x32xbf16>
    %cst_23 = arith.constant dense<0.000000e+00> : vector<16x128xf32>
    %118 = tpu.matmul %117, %3, %cst_23 {dimension_numbers = #tpu.dot_dimension_numbers<[1], [0], [0], [1], [0, 0, 1, 1], [], []>} : vector<16x32xbf16>, vector<32x128xbf16>, vector<16x128xf32> -> vector<16x128xf32>
    %119 = arith.addf %116, %118 : vector<16x128xf32>
    %120 = arith.negf %119 : vector<16x128xf32>
    %121 = math.exp %120 : vector<16x128xf32>
    %cst_24 = arith.constant 1.000000e+00 : f32
    %122 = vector.broadcast %cst_24 : f32 to vector<16x128xf32>
    %123 = arith.addf %122, %121 : vector<16x128xf32>
    %124 = arith.divf %122, %123 : vector<16x128xf32>
    %125 = math.tanh %119 : vector<16x128xf32>
    %126 = vector.extract_strided_slice %124 {offsets = [0, 0], sizes = [16, 32], strides = [1, 1]} : vector<16x128xf32> to vector<16x32xf32>
    %127 = vector.extract_strided_slice %124 {offsets = [0, 32], sizes = [16, 32], strides = [1, 1]} : vector<16x128xf32> to vector<16x32xf32>
    %128 = vector.extract_strided_slice %124 {offsets = [0, 64], sizes = [16, 32], strides = [1, 1]} : vector<16x128xf32> to vector<16x32xf32>
    %129 = vector.extract_strided_slice %125 {offsets = [0, 96], sizes = [16, 32], strides = [1, 1]} : vector<16x128xf32> to vector<16x32xf32>
    %130 = arith.mulf %127, %113 : vector<16x32xf32>
    %131 = arith.mulf %126, %129 : vector<16x32xf32>
    %132 = arith.addf %130, %131 : vector<16x32xf32>
    %133 = math.tanh %132 : vector<16x32xf32>
    %134 = arith.mulf %128, %133 : vector<16x32xf32>
    %135 = vector.extract_strided_slice %9 {offsets = [16, 0], sizes = [16, 128], strides = [1, 1]} : vector<128x128xf32> to vector<16x128xf32>
    %136 = arith.truncf %134 : vector<16x32xf32> to vector<16x32xbf16>
    %cst_25 = arith.constant dense<0.000000e+00> : vector<16x128xf32>
    %137 = tpu.matmul %136, %3, %cst_25 {dimension_numbers = #tpu.dot_dimension_numbers<[1], [0], [0], [1], [0, 0, 1, 1], [], []>} : vector<16x32xbf16>, vector<32x128xbf16>, vector<16x128xf32> -> vector<16x128xf32>
    %138 = arith.addf %135, %137 : vector<16x128xf32>
    %139 = arith.negf %138 : vector<16x128xf32>
    %140 = math.exp %139 : vector<16x128xf32>
    %cst_26 = arith.constant 1.000000e+00 : f32
    %141 = vector.broadcast %cst_26 : f32 to vector<16x128xf32>
    %142 = arith.addf %141, %140 : vector<16x128xf32>
    %143 = arith.divf %141, %142 : vector<16x128xf32>
    %144 = math.tanh %138 : vector<16x128xf32>
    %145 = vector.extract_strided_slice %143 {offsets = [0, 0], sizes = [16, 32], strides = [1, 1]} : vector<16x128xf32> to vector<16x32xf32>
    %146 = vector.extract_strided_slice %143 {offsets = [0, 32], sizes = [16, 32], strides = [1, 1]} : vector<16x128xf32> to vector<16x32xf32>
    %147 = vector.extract_strided_slice %143 {offsets = [0, 64], sizes = [16, 32], strides = [1, 1]} : vector<16x128xf32> to vector<16x32xf32>
    %148 = vector.extract_strided_slice %144 {offsets = [0, 96], sizes = [16, 32], strides = [1, 1]} : vector<16x128xf32> to vector<16x32xf32>
    %149 = arith.mulf %146, %132 : vector<16x32xf32>
    %150 = arith.mulf %145, %148 : vector<16x32xf32>
    %151 = arith.addf %149, %150 : vector<16x32xf32>
    %152 = math.tanh %151 : vector<16x32xf32>
    %153 = arith.mulf %147, %152 : vector<16x32xf32>
    %154 = vector.extract_strided_slice %9 {offsets = [0, 0], sizes = [16, 128], strides = [1, 1]} : vector<128x128xf32> to vector<16x128xf32>
    %155 = arith.truncf %153 : vector<16x32xf32> to vector<16x32xbf16>
    %cst_27 = arith.constant dense<0.000000e+00> : vector<16x128xf32>
    %156 = tpu.matmul %155, %3, %cst_27 {dimension_numbers = #tpu.dot_dimension_numbers<[1], [0], [0], [1], [0, 0, 1, 1], [], []>} : vector<16x32xbf16>, vector<32x128xbf16>, vector<16x128xf32> -> vector<16x128xf32>
    %157 = arith.addf %154, %156 : vector<16x128xf32>
    %158 = arith.negf %157 : vector<16x128xf32>
    %159 = math.exp %158 : vector<16x128xf32>
    %cst_28 = arith.constant 1.000000e+00 : f32
    %160 = vector.broadcast %cst_28 : f32 to vector<16x128xf32>
    %161 = arith.addf %160, %159 : vector<16x128xf32>
    %162 = arith.divf %160, %161 : vector<16x128xf32>
    %163 = math.tanh %157 : vector<16x128xf32>
    %164 = vector.extract_strided_slice %162 {offsets = [0, 0], sizes = [16, 32], strides = [1, 1]} : vector<16x128xf32> to vector<16x32xf32>
    %165 = vector.extract_strided_slice %162 {offsets = [0, 32], sizes = [16, 32], strides = [1, 1]} : vector<16x128xf32> to vector<16x32xf32>
    %166 = vector.extract_strided_slice %162 {offsets = [0, 64], sizes = [16, 32], strides = [1, 1]} : vector<16x128xf32> to vector<16x32xf32>
    %167 = vector.extract_strided_slice %163 {offsets = [0, 96], sizes = [16, 32], strides = [1, 1]} : vector<16x128xf32> to vector<16x32xf32>
    %168 = arith.mulf %165, %151 : vector<16x32xf32>
    %169 = arith.mulf %164, %167 : vector<16x32xf32>
    %170 = arith.addf %168, %169 : vector<16x32xf32>
    %171 = math.tanh %170 : vector<16x32xf32>
    %172 = arith.mulf %166, %171 : vector<16x32xf32>
    %c0_29 = arith.constant 0 : index
    %c0_30 = arith.constant 0 : index
    %173 = vector.load %arg7[%c0_29, %c0_30] : memref<32x128xf32, #tpu.memory_space<vmem>>, vector<32x128xf32>
    %cst_31 = arith.constant dense<0.000000e+00> : vector<16x128xf32>
    %174 = tpu.matmul %26, %173, %cst_31 {dimension_numbers = #tpu.dot_dimension_numbers<[1], [0], [0], [1], [0, 0, 1, 1], [], []>} : vector<16x32xf32>, vector<32x128xf32>, vector<16x128xf32> -> vector<16x128xf32>
    %c0_32 = arith.constant 0 : index
    %c0_33 = arith.constant 0 : index
    %175 = vector.load %arg8[%c0_32, %c0_33] : memref<32x128xf32, #tpu.memory_space<vmem>>, vector<32x128xf32>
    %cst_34 = arith.constant dense<0.000000e+00> : vector<16x128xf32>
    %176 = tpu.matmul %172, %175, %cst_34 {dimension_numbers = #tpu.dot_dimension_numbers<[1], [0], [0], [1], [0, 0, 1, 1], [], []>} : vector<16x32xf32>, vector<32x128xf32>, vector<16x128xf32> -> vector<16x128xf32>
    %177 = arith.addf %174, %176 : vector<16x128xf32>
    %c0_35 = arith.constant 0 : index
    %c0_36 = arith.constant 0 : index
    %178 = vector.load %arg9[%c0_35, %c0_36] : memref<1x128xf32, #tpu.memory_space<vmem>>, vector<1x128xf32>
    %179 = vector.broadcast %178 : vector<1x128xf32> to vector<16x128xf32>
    %180 = arith.addf %177, %179 : vector<16x128xf32>
    %cst_37 = arith.constant dense<0xFF800000> : vector<16xf32>
    %181 = vector.multi_reduction <maximumf>, %180, %cst_37 [1] : vector<16x128xf32> to vector<16xf32>
    %182 = vector.shape_cast %181 : vector<16xf32> to vector<16x1xf32>
    %183 = vector.broadcast %182 : vector<16x1xf32> to vector<16x128xf32>
    %184 = arith.subf %180, %183 : vector<16x128xf32>
    %185 = math.exp %184 : vector<16x128xf32>
    %cst_38 = arith.constant dense<0.000000e+00> : vector<16xf32>
    %186 = vector.multi_reduction <add>, %185, %cst_38 [1] : vector<16x128xf32> to vector<16xf32>
    %187 = vector.shape_cast %186 : vector<16xf32> to vector<16x1xf32>
    %188 = math.log %187 : vector<16x1xf32>
    %189 = vector.broadcast %188 : vector<16x1xf32> to vector<16x128xf32>
    %190 = arith.subf %184, %189 : vector<16x128xf32>
    %c0_39 = arith.constant 0 : index
    %c0_40 = arith.constant 0 : index
    %191 = vector.load %arg10[%c0_39, %c0_40] : memref<16x128xf32, #tpu.memory_space<vmem>>, vector<16x128xf32>
    tpu.vector_store %arg10[%c0_39, %c0_40], %190 {strides = array<i32>} : memref<16x128xf32, #tpu.memory_space<vmem>>, vector<16x128xf32>,
    return
  }
  func.func @transform_0(%arg0: i32) -> (i32, i32, i32) {
    %c0_i32 = arith.constant 0 : i32
    %c0_i32_0 = arith.constant 0 : i32
    %c0_i32_1 = arith.constant 0 : i32
    return %c0_i32, %arg0, %c0_i32_0 : i32, i32, i32
  }
  func.func @transform_1(%arg0: i32) -> (i32, i32) {
    %c0_i32 = arith.constant 0 : i32
    %c0_i32_0 = arith.constant 0 : i32
    %c0_i32_1 = arith.constant 0 : i32
    return %c0_i32, %c0_i32_0 : i32, i32
  }
  func.func @transform_2(%arg0: i32) -> (i32, i32) {
    %c0_i32 = arith.constant 0 : i32
    %c0_i32_0 = arith.constant 0 : i32
    %c0_i32_1 = arith.constant 0 : i32
    return %c0_i32, %c0_i32_0 : i32, i32
  }
  func.func @transform_3(%arg0: i32) -> (i32, i32) {
    %c0_i32 = arith.constant 0 : i32
    %c0_i32_0 = arith.constant 0 : i32
    %c0_i32_1 = arith.constant 0 : i32
    return %c0_i32, %c0_i32_0 : i32, i32
  }
  func.func @transform_4(%arg0: i32) -> (i32, i32) {
    %c0_i32 = arith.constant 0 : i32
    %c0_i32_0 = arith.constant 0 : i32
    %c0_i32_1 = arith.constant 0 : i32
    return %c0_i32, %c0_i32_0 : i32, i32
  }
  func.func @transform_5(%arg0: i32) -> (i32, i32) {
    %c0_i32 = arith.constant 0 : i32
    %c0_i32_0 = arith.constant 0 : i32
    %c0_i32_1 = arith.constant 0 : i32
    return %c0_i32, %c0_i32_0 : i32, i32
  }
  func.func @transform_6(%arg0: i32) -> (i32, i32) {
    %c0_i32 = arith.constant 0 : i32
    %c0_i32_0 = arith.constant 0 : i32
    %c0_i32_1 = arith.constant 0 : i32
    return %c0_i32, %c0_i32_0 : i32, i32
  }
  func.func @transform_7(%arg0: i32) -> (i32, i32) {
    %c0_i32 = arith.constant 0 : i32
    %c0_i32_0 = arith.constant 0 : i32
    %c0_i32_1 = arith.constant 0 : i32
    return %c0_i32, %c0_i32_0 : i32, i32
  }
  func.func @transform_8(%arg0: i32) -> (i32, i32) {
    %c0_i32 = arith.constant 0 : i32
    %c0_i32_0 = arith.constant 0 : i32
    %c0_i32_1 = arith.constant 0 : i32
    return %c0_i32, %c0_i32_0 : i32, i32
  }
  func.func @transform_9(%arg0: i32) -> (i32, i32) {
    %c0_i32 = arith.constant 0 : i32
    %c0_i32_0 = arith.constant 0 : i32
    return %arg0, %c0_i32 : i32, i32
  }
}

</mosaic_0001>

<bundles_post_ra>
// kernel: tpu_custom_call.1
= control target key start
LH: loop header
LB: loop body
LE: loop exit
PB: predicated region body
PF: predicated region fallthrough
CT: control target
= control target key end

     0   :  { %14 = vsyncpa [#allocation3], 0  ;;  %s2181_s0 = inlined_call_operand.hbm [shape: bf16[8,16,128], index: 0, kind: input, shape index: {}]   ;;  %s2182_s1 = inlined_call_operand.hbm [shape: bf16[128,128], index: 1, kind: input, shape index: {}]   ;;  %s2183_s2 = inlined_call_operand.vmem [shape: f32[1,128], index: 2, kind: input, shape index: {}]   ;;  %s2184_s3 = inlined_call_operand.hbm [shape: bf16[128,128], index: 3, kind: input, shape index: {}]   ;;  %s2185_s4 = inlined_call_operand.hbm [shape: bf16[32,128], index: 4, kind: input, shape index: {}]   ;;  %s2186_s5 = inlined_call_operand.vmem [shape: f32[1,128], index: 5, kind: input, shape index: {}]   ;;  %s2187_s6 = inlined_call_operand.hbm [shape: f32[32,128], index: 6, kind: input, shape index: {}]   ;;  %s2188_s7 = inlined_call_operand.hbm [shape: f32[32,128], index: 7, kind: input, shape index: {}]   ;;  %s2189_s8 = inlined_call_operand.vmem [shape: f32[1,128], index: 8, kind: input, shape index: {}]   ;;  %s2190_s9 = inlined_call_operand.hbm [shape: f32[16,128], index: 9, kind: output, shape index: {}]  }
   0x1   :  { %15 = vsyncpa [#allocation6], 0 }
   0x2   :  { %16 = vsyncpa [#allocation9], 0 }
   0x3   :  { %17 = vsyncpa [#allocation12], 0 }
   0x4   :  { %18 = vsyncpa [#allocation4], 0  ;;  %s36_s11 = sshll.u32 %s2182_s1, 4  ;;  %s1864_s12 = smov [#allocation5]   ;;  %s37_s11 = int_to_ptr.hbm [resolvable:$true] %s36_s11 }
   0x5   :  { %s38_s13 = sshll.u32 %s1864_s12, 4  ;;  %s64_s16 = sshll.u32 %s2185_s4, 4  ;;  %s39_s13 = int_to_ptr.vmem [resolvable:$true] %s38_s13  ;;  %s65_s16 = int_to_ptr.hbm [resolvable:$true] %s64_s16 }
   0x6   :  { %s1865_s17 = smov 64   ;;  %s1866_s18 = smov 4  }
   0x7   :  { %44 = dma.hbm_to_vmem [thread:$0]  %s37_s11, 1024, %s39_s13, [#allocation6], %s1865_s17, %s1865_s17, %s1866_s18  }
   0x8   :  { %s1867_s19 = smov [#allocation8]   ;;  %s23_s1 = sshll.u32 %s2181_s0, 4  ;;  %s24_s1 = int_to_ptr.hbm [resolvable:$true] %s23_s1 }
   0x9   :  { %s66_s20 = sshll.u32 %s1867_s19, 4  ;;  %s51_s4 = sshll.u32 %s2184_s3, 4  ;;  %s67_s20 = int_to_ptr.vmem [resolvable:$true] %s66_s20  ;;  %s52_s4 = int_to_ptr.hbm [resolvable:$true] %s51_s4 }
   0xa   :  { %72 = dma.hbm_to_vmem [thread:$0]  %s65_s16, 256, %s67_s20, [#allocation9], %s1865_s17, %s1865_s17, %s1866_s18  }
   0xb   :  { %s1868_s25 = smov [#allocation2]   ;;  %s1869_s27 = smov [#allocation7]  }
   0xc   :  { %s25_s26 = sshll.u32 %s1868_s25, 4  ;;  %s53_s28 = sshll.u32 %s1869_s27, 4  ;;  %s26_s26 = int_to_ptr.vmem [resolvable:$true] %s25_s26  ;;  %s54_s28 = int_to_ptr.vmem [resolvable:$true] %s53_s28 }
   0xd   :  { %31 = dma.hbm_to_vmem [thread:$0]  %s24_s1, 1024, %s26_s26, [#allocation3], %s1865_s17, %s1865_s17, %s1866_s18  }
   0xe   :  { %s79_s30 = sshll.u32 %s2187_s6, 4  ;;  %s1870_s10 = smov [#allocation10]   ;;  %s80_s30 = int_to_ptr.hbm [resolvable:$true] %s79_s30 }
   0xf   :  { %59 = dma.hbm_to_vmem [thread:$0]  %s52_s4, 1024, %s54_s28, [#allocation6], %s1865_s17, %s1865_s17, %s1866_s18  }
  0x10   :  { %s81_s3 = sshll.u32 %s1870_s10, 4  ;;  %s92_s13 = sshll.u32 %s2188_s7, 4  ;;  %s82_s3 = int_to_ptr.vmem [resolvable:$true] %s81_s3  ;;  %s93_s13 = int_to_ptr.hbm [resolvable:$true] %s92_s13 }
  0x11   :  { %s1871_s14 = smov 128   ;;  %s1872_s15 = smov 8  }
  0x12   :  { %87 = dma.hbm_to_vmem [thread:$0]  %s80_s30, 512, %s82_s3, [#allocation9], %s1871_s14, %s1871_s14, %s1872_s15  }
  0x13   :  { %s1873_s6 = smov [#allocation11]  }
  0x14   :  { %s94_s16 = sshll.u32 %s1873_s6, 4  ;;  %s95_s16 = int_to_ptr.vmem [resolvable:$true] %s94_s16 }
  0x15   :  { %100 = dma.hbm_to_vmem [thread:$0]  %s93_s13, 512, %s95_s16, [#allocation12], %s1871_s14, %s1871_s14, %s1872_s15  }
  0x16   :  { %1854 = dma.done.wait [#allocation3], 1024  }
  0x17   :  { %1855 = vsyncadd [#allocation3], 4294966272 }
  0x18   :  { %1856 = dma.done.wait [#allocation6], 2048  }
  0x19   :  { %1857 = vsyncadd [#allocation6], 4294965248 }
  0x1a   :  { %1858 = dma.done.wait [#allocation9], 768  }
  0x1b   :  { %1859 = vsyncadd [#allocation9], 4294966528 }
  0x1c   :  { %1860 = dma.done.wait [#allocation12], 512  }
  0x1d   :  { %1861 = vsyncadd [#allocation12], 4294966784  ;;  %v1491_v0 = vld [vmem:[#allocation7 + $0x38] sm:$0xff]  ;;  %v1490_v1 = vld [vmem:[#allocation7 + $0x30] sm:$0xff]  ;;  %s1874_s19 = smov 32   ;;  %vm535_vm8 = vcmask 261120  }
  0x1e   :  { %1503 = vmatpush.bf16.msra.mxu2 %v1491_v0  ;;  %1502 = vmatpush.bf16.msra.mxu1 %v1491_v0  ;;  %v1489_v2 = vld [vmem:[#allocation7 + $0x28] sm:$0xff]  ;;  %v1488_v3 = vld [vmem:[#allocation7 + $0x20] sm:$0xff]  ;;  %v1487_v4 = vld [vmem:[#allocation7 + $0x18] sm:$0xff]  ;;  %s1327_s4 = sshll.u32 %s2190_s9, 4  ;;  %s1328_s4 = int_to_ptr.hbm [resolvable:$true] %s1327_s4 }
  0x1f   :  { %281 = vmatpush.bf16.msra.mxu0 %v1491_v0  ;;  %v1486_v5 = vld [vmem:[#allocation7 + $0x10] sm:$0xff]  ;;  %v1485_v6 = vld [vmem:[#allocation7 + $0x8] sm:$0xff]  ;;  %v1484_v7 = vld [vmem:[#allocation7] sm:$0xff] }
  0x20   :  { %v1501_v8 = vld [vmem:[#allocation2 + $0x38] sm:$0xff]  ;;  %v1961_v9 = vld [vmem:[%s2186_s5] ss:$0 sm:$0xff]  ;;  %v1970_v49 = vld [vmem:[#allocation8 + $0x8] sm:$0xff] }
  0x21   :  { %v1498_v48 = vld [vmem:[#allocation2 + $0x20] sm:$0xff]  ;;  %545 = vmatpush.bf16.msra.mxu3 %v1970_v49  ;;  %v1499_v51 = vld [vmem:[#allocation2 + $0x28] sm:$0xff]  ;;  %v1500_v57 = vld [vmem:[#allocation2 + $0x30] sm:$0xff] }
  0x22   :  { %1505 = vmatpush.bf16.msra.mxu2 %v1490_v1  ;;  %1504 = vmatpush.bf16.msra.mxu1 %v1490_v1  ;;  %v1973_v50 = vld [vmem:[#allocation8] sm:$0xff] }
  0x23   :  { %282 = vmatpush.bf16.msra.mxu0 %v1490_v1 }
  0x25   :  { %546 = vmatpush.bf16.msra.mxu3 %v1973_v50 }
  0x26   :  { %1507 = vmatpush.bf16.msra.mxu2 %v1489_v2  ;;  %1506 = vmatpush.bf16.msra.mxu1 %v1489_v2 }
  0x27   :  { %283 = vmatpush.bf16.msra.mxu0 %v1489_v2 }
  0x29   :  { %650 = vmatpush.bf16.msrb.mxu3 %v1970_v49 }
  0x2a   :  { %1509 = vmatpush.bf16.msra.mxu2 %v1488_v3  ;;  %1508 = vmatpush.bf16.msra.mxu1 %v1488_v3 }
  0x2b   :  { %284 = vmatpush.bf16.msra.mxu0 %v1488_v3 }
  0x2d   :  { %651 = vmatpush.bf16.msrb.mxu3 %v1973_v50 }
  0x2e   :  { %1511 = vmatpush.bf16.msra.mxu2 %v1487_v4  ;;  %1510 = vmatpush.bf16.msra.mxu1 %v1487_v4 }
  0x2f   :  { %285 = vmatpush.bf16.msra.mxu0 %v1487_v4 }
  0x32   :  { %1513 = vmatpush.bf16.msra.mxu2 %v1486_v5  ;;  %1512 = vmatpush.bf16.msra.mxu1 %v1486_v5 }
  0x33   :  { %286 = vmatpush.bf16.msra.mxu0 %v1486_v5 }
  0x36   :  { %1515 = vmatpush.bf16.msra.mxu2 %v1485_v6  ;;  %1514 = vmatpush.bf16.msra.mxu1 %v1485_v6 }
  0x37   :  { %287 = vmatpush.bf16.msra.mxu0 %v1485_v6 }
  0x3a   :  { %1517 = vmatpush.bf16.msra.mxu2 %v1484_v7  ;;  %1516 = vmatpush.bf16.msra.mxu1 %v1484_v7 }
  0x3b   :  { %288 = vmatpush.bf16.msra.mxu0 %v1484_v7 }
  0x3d   :  { %324 = vmatmul.bf16.vlgmr.msra.gmra.mxu2 %v1501_v8  ;;  %309 = vmatmul.bf16.vlgmr.msra.gmra.mxu1 %v1498_v48 }
  0x3e   :  { %747 = vmatpush.bf16.msrb.mxu2 %v1970_v49 }
  0x42   :  { %748 = vmatpush.bf16.msrb.mxu2 %v1973_v50 }
  0x46   :  { %941 = vmatpush.bf16.msra.mxu2 %v1970_v49 }
  0x4a   :  { %942 = vmatpush.bf16.msra.mxu2 %v1973_v50 }
  0x4d   :  { %314 = vmatmul.bf16.gmra.mxu1 %v1499_v51 }
  0x5d   :  { %319 = vmatmul.bf16.gmra.mxu1 %v1500_v57 }
  0xba   :  { %v1986_v59 = vpop.f32.mrf.mxu1 }
  0xc0   :  { %v325_v10 = vpop.f32.mrf.mxu2 }
  0xc1   :  { %v326_v11 = vadd.f32 %v1961_v9, %v325_v10 }
  0xc2   :  { %v1988_v60 = vpop.f32.mrf.mxu1 }
  0xc3   :  { %1533 = vtanh.f32 %v326_v11  ;;  %v1441_v16 = vmul.f32 -1.442695, %v326_v11 }
  0xc8   :  { %v327_v12 = vpop.f32.mrf.mxu2 }
  0xc9   :  { %v1534_v13 = vpop.eup %1533  ;;  %v328_v14 = vadd.f32 %v1961_v9, %v327_v12 }
  0xca   :  { %499 = vrot.lane.b32.xlu0 %v1534_v13, %s1874_s19  ;;  %v1990_v61 = vpop.f32.mrf.mxu1 }
  0xcb   :  { %1535 = vtanh.f32 %v328_v14  ;;  %v1442_v17 = vmul.f32 -1.442695, %v328_v14 }
  0xcc   :  { %1537 = vpow2.f32 %v1441_v16 }
  0xcd   :  { %1539 = vpow2.f32 %v1442_v17 }
  0xd1   :  { %v1536_v15 = vpop.eup %1535 }
  0xd2   :  { %501 = vrot.lane.b32.xlu0 %v1536_v15, %s1874_s19  ;;  %v1538_v18 = vpop.eup %1537  ;;  %v1992_v62 = vpop.f32.mrf.mxu1 }
  0xd3   :  { %v463_v19 = vadd.f32 1.0, %v1538_v18  ;;  %v1540_v20 = vpop.eup %1539 }
  0xd4   :  { %v464_v21 = vadd.f32 1.0, %v1540_v20 }
  0xd5   :  { %1541 = vrcp.f32 %v463_v19  ;;  %v476_v30 = vand.u32 2147483648, %v463_v19  ;;  %vm470_vm1 = vweird.f32 %v463_v19  ;;  %v474_v31 = vand.u32 2147483647, %v463_v19 }
  0xd6   :  { %1543 = vrcp.f32 %v464_v21  ;;  %v491_v39 = vand.u32 2147483648, %v464_v21  ;;  %vm485_vm5 = vweird.f32 %v464_v21  ;;  %v489_v40 = vand.u32 2147483647, %v464_v21 }
  0xd7   :  { %v477_v34 = vor.u32 1.1754944e-38, %v476_v30  ;;  %vm475_vm3 = vcmp.eq.f32.partialorder %v474_v31, 8.507059e+37 }
  0xd8   :  { %v492_v42 = vor.u32 1.1754944e-38, %v491_v39  ;;  %vm490_vm7 = vcmp.eq.f32.partialorder %v489_v40, 8.507059e+37 }
  0xda   :  { %v320_v63 = vpop.f32.mrf.mxu1 }
  0xdb   :  { %v1542_v22 = vpop.eup %1541  ;;  %v321_v0 = vadd.f32 %v1961_v9, %v320_v63 }
  0xdc   :  { %v466_v23 = vmul.f32 %v1542_v22, %v463_v19  ;;  %v1544_v25 = vpop.eup %1543  ;;  %vm471_vm0 = vweird.f32 %v1542_v22 }
  0xdd   :  { %v481_v27 = vmul.f32 %v1544_v25, %v464_v21  ;;  %vm472_vm2 = vmor %vm470_vm1, %vm471_vm0  ;;  %vm486_vm4 = vweird.f32 %v1544_v25 }
  0xde   :  { %v467_v24 = vsub.f32 1.0, %v466_v23  ;;  %vm487_vm6 = vmor %vm485_vm5, %vm486_vm4 }
  0xdf   :  { %v482_v29 = vsub.f32 1.0, %v481_v27 }
  0xe0   :  { %v468_v26 = vmul.f32 %v1542_v22, %v467_v24 }
  0xe1   :  { %v483_v33 = vmul.f32 %v1544_v25, %v482_v29 }
  0xe2   :  { %v469_v28 = vadd.f32 %v1542_v22, %v468_v26  ;;  %v322_v3 = vpop.f32.mrf.mxu1 }
  0xe3   :  { %v484_v38 = vadd.f32 %v1544_v25, %v483_v33  ;;  %v323_v4 = vadd.f32 %v1961_v9, %v322_v3 }
  0xe4   :  { %v473_v32 = vsel %vm472_vm2, %v1542_v22, %v469_v28 }
  0xe5   :  { %v478_v36 = vsel %vm475_vm3, %v477_v34, %v473_v32  ;;  %v488_v41 = vsel %vm487_vm6, %v1544_v25, %v484_v38 }
  0xe6   :  { %v493_v43 = vsel %vm490_vm7, %v492_v42, %v488_v41 }
 0x13c   :  { %v500_v35 = vpop.permute.xlu0 %499 }
 0x13d   :  { %v505_v37 = vmul.f32 %v500_v35, %v478_v36 }
 0x13f   :  { %1545 = vtanh.f32 %v505_v37 }
 0x144   :  { %v502_v44 = vpop.permute.xlu0 %501 }
 0x145   :  { %v1546_v45 = vpop.eup %1545  ;;  %v506_v46 = vmul.f32 %v502_v44, %v493_v43 }
 0x146   :  { %511 = vrot.lane.b32.xlu1 %v1546_v45, %s1865_s17 }
 0x147   :  { %1547 = vtanh.f32 %v506_v46 }
 0x14d   :  { %v1548_v47 = vpop.eup %1547 }
 0x14e   :  { %513 = vrot.lane.b32.xlu1 %v1548_v47, %s1865_s17 }
 0x156   :  { %597 = vrot.lane.b32.xlu1 %v505_v37, %s1874_s19 }
 0x1b8   :  { %v512_v52 = vpop.permute.xlu1 %511 }
 0x1b9   :  { %v517_v54 = vmul.f32 %v512_v52, %v478_v36 }
 0x1c0   :  { %v514_v53 = vpop.permute.xlu1 %513 }
 0x1c1   :  { %v518_v55 = vmul.f32 %v514_v53, %v493_v43 }
 0x1c3   :  { %v519_v56 = vpack.c.bf16 %v518_v55, %v517_v54 }
 0x1c5   :  { %521 = vrot.lane.b32.xlu2 %v519_v56, %s1865_s17 }
 0x1c8   :  { %v598_v40 = vpop.permute.xlu1 %597 }
 0x21f   :  { %v522_v58 = vpop.permute.xlu2 %521 }
 0x220   :  { %1451 = vmatmul.msk.bf16.vlgmr.msra.gmra.mxu3 %vm535_vm8, %v522_v58  ;;  %v316_v58 = vadd.f32 %v1961_v9, %v1990_v61 }
 0x221   :  { %844 = vmatpush.bf16.msra.mxu3 %v1970_v49 }
 0x225   :  { %845 = vmatpush.bf16.msra.mxu3 %v1973_v50 }
 0x2a3   :  { %v548_v1 = vpop.f32.mrf.mxu3 }
 0x2a4   :  { %v553_v2 = vadd.f32 %v548_v1, %v321_v0  ;;  %v318_v1 = vadd.f32 %v1961_v9, %v1992_v62 }
 0x2a6   :  { %1549 = vtanh.f32 %v553_v2  ;;  %v1452_v10 = vmul.f32 -1.442695, %v553_v2 }
 0x2ab   :  { %v550_v5 = vpop.f32.mrf.mxu3 }
 0x2ac   :  { %v1550_v6 = vpop.eup %1549  ;;  %v554_v7 = vadd.f32 %v550_v5, %v323_v4 }
 0x2ad   :  { %607 = vrot.lane.b32.xlu2 %v1550_v6, %s1874_s19 }
 0x2ae   :  { %1551 = vtanh.f32 %v554_v7  ;;  %v1453_v16 = vmul.f32 -1.442695, %v554_v7 }
 0x2af   :  { %1553 = vpow2.f32 %v1452_v10 }
 0x2b4   :  { %v1552_v8 = vpop.eup %1551 }
 0x2b5   :  { %609 = vrot.lane.b32.xlu0 %v1552_v8, %s1874_s19  ;;  %599 = vrot.lane.b32.xlu2 %v506_v46, %s1874_s19  ;;  %v1554_v11 = vpop.eup %1553 }
 0x2b6   :  { %v561_v12 = vadd.f32 1.0, %v1554_v11 }
 0x2b8   :  { %1555 = vrcp.f32 %v561_v12  ;;  %v574_v19 = vand.u32 2147483648, %v561_v12  ;;  %vm568_vm10 = vweird.f32 %v561_v12  ;;  %v572_v20 = vand.u32 2147483647, %v561_v12 }
 0x2b9   :  { %1557 = vpow2.f32 %v1453_v16 }
 0x2ba   :  { %v575_v23 = vor.u32 1.1754944e-38, %v574_v19  ;;  %vm573_vm12 = vcmp.eq.f32.partialorder %v572_v20, 8.507059e+37 }
 0x2be   :  { %v1556_v13 = vpop.eup %1555 }
 0x2bf   :  { %v564_v14 = vmul.f32 %v1556_v13, %v561_v12  ;;  %vm569_vm9 = vweird.f32 %v1556_v13  ;;  %v1558_v21 = vpop.eup %1557 }
 0x2c0   :  { %vm570_vm11 = vmor %vm568_vm10, %vm569_vm9  ;;  %v562_v24 = vadd.f32 1.0, %v1558_v21 }
 0x2c1   :  { %v565_v15 = vsub.f32 1.0, %v564_v14 }
 0x2c2   :  { %1559 = vrcp.f32 %v562_v24  ;;  %v589_v33 = vand.u32 2147483648, %v562_v24  ;;  %vm583_vm14 = vweird.f32 %v562_v24  ;;  %v587_v34 = vand.u32 2147483647, %v562_v24 }
 0x2c3   :  { %v566_v17 = vmul.f32 %v1556_v13, %v565_v15 }
 0x2c4   :  { %v590_v36 = vor.u32 1.1754944e-38, %v589_v33  ;;  %vm588_vm0 = vcmp.eq.f32.partialorder %v587_v34, 8.507059e+37 }
 0x2c5   :  { %v567_v18 = vadd.f32 %v1556_v13, %v566_v17 }
 0x2c7   :  { %v571_v22 = vsel %vm570_vm11, %v1556_v13, %v567_v18 }
 0x2c8   :  { %v576_v26 = vsel %vm573_vm12, %v575_v23, %v571_v22  ;;  %v1560_v28 = vpop.eup %1559 }
 0x2c9   :  { %v579_v29 = vmul.f32 %v1560_v28, %v562_v24  ;;  %vm584_vm13 = vweird.f32 %v1560_v28  ;;  %v603_v41 = vmul.f32 %v598_v40, %v576_v26 }
 0x2ca   :  { %vm585_vm15 = vmor %vm583_vm14, %vm584_vm13 }
 0x2cb   :  { %v580_v30 = vsub.f32 1.0, %v579_v29 }
 0x2cd   :  { %v581_v31 = vmul.f32 %v1560_v28, %v580_v30 }
 0x2cf   :  { %v582_v32 = vadd.f32 %v1560_v28, %v581_v31 }
 0x2d1   :  { %v586_v35 = vsel %vm585_vm15, %v1560_v28, %v582_v32 }
 0x2d2   :  { %v591_v37 = vsel %vm588_vm0, %v590_v36, %v586_v35 }
 0x307   :  { %v608_v25 = vpop.permute.xlu2 %607 }
 0x308   :  { %v613_v27 = vmul.f32 %v608_v25, %v576_v26 }
 0x30a   :  { %617 = vrot.lane.b32.xlu0 %v613_v27, %s1874_s19 }
 0x30f   :  { %v600_v45 = vpop.permute.xlu2 %599 }
 0x310   :  { %v604_v46 = vmul.f32 %v600_v45, %v591_v37 }
 0x327   :  { %v610_v38 = vpop.permute.xlu0 %609 }
 0x328   :  { %v614_v39 = vmul.f32 %v610_v38, %v591_v37 }
 0x32a   :  { %619 = vrot.lane.b32.xlu1 %v614_v39, %s1874_s19 }
 0x37c   :  { %v618_v42 = vpop.permute.xlu0 %617 }
 0x37d   :  { %v2001_v43 = vadd.f32 %v618_v42, %v603_v41 }
 0x37f   :  { %1561 = vtanh.f32 %v2001_v43 }
 0x385   :  { %v1562_v44 = vpop.eup %1561 }
 0x386   :  { %629 = vrot.lane.b32.xlu2 %v1562_v44, %s1874_s19 }
 0x39c   :  { %v620_v47 = vpop.permute.xlu1 %619 }
 0x39d   :  { %v2005_v48 = vadd.f32 %v620_v47, %v604_v46 }
 0x39f   :  { %1563 = vtanh.f32 %v2005_v48 }
 0x3a5   :  { %v1564_v51 = vpop.eup %1563 }
 0x3a6   :  { %631 = vrot.lane.b32.xlu0 %v1564_v51, %s1874_s19 }
 0x3e0   :  { %v630_v52 = vpop.permute.xlu2 %629 }
 0x3e1   :  { %v635_v54 = vmul.f32 %v630_v52, %v576_v26 }
 0x418   :  { %v632_v53 = vpop.permute.xlu0 %631 }
 0x419   :  { %v636_v55 = vmul.f32 %v632_v53, %v591_v37 }
 0x41b   :  { %v637_v56 = vpack.c.bf16 %v636_v55, %v635_v54  ;;  %v313_v54 = vadd.f32 %v1961_v9, %v1988_v60 }
 0x41d   :  { %639 = vrot.lane.b32.xlu1 %v637_v56, %s1865_s17 }
 0x48f   :  { %v640_v57 = vpop.permute.xlu1 %639 }
 0x490   :  { %1454 = vmatmul.msk.bf16.vlgmr.msrb.gmra.mxu3 %vm535_vm8, %v640_v57 }
 0x491   :  { %1038 = vmatpush.bf16.msrb.mxu3 %v1970_v49 }
 0x495   :  { %1039 = vmatpush.bf16.msrb.mxu3 %v1973_v50 }
 0x513   :  { %v653_v63 = vpop.f32.mrf.mxu3 }
 0x514   :  { %v658_v0 = vadd.f32 %v653_v63, %v316_v58 }
 0x516   :  { %1565 = vtanh.f32 %v658_v0  ;;  %v1455_v6 = vmul.f32 -1.442695, %v658_v0 }
 0x51b   :  { %v655_v2 = vpop.f32.mrf.mxu3 }
 0x51c   :  { %v1566_v3 = vpop.eup %1565  ;;  %v659_v4 = vadd.f32 %v655_v2, %v318_v1 }
 0x51d   :  { %704 = vrot.lane.b32.xlu2 %v1566_v3, %s1874_s19 }
 0x51e   :  { %1567 = vtanh.f32 %v659_v4  ;;  %v1456_v12 = vmul.f32 -1.442695, %v659_v4 }
 0x51f   :  { %1569 = vpow2.f32 %v1455_v6 }
 0x524   :  { %v1568_v5 = vpop.eup %1567 }
 0x525   :  { %706 = vrot.lane.b32.xlu0 %v1568_v5, %s1874_s19  ;;  %v1570_v7 = vpop.eup %1569 }
 0x526   :  { %v666_v8 = vadd.f32 1.0, %v1570_v7 }
 0x528   :  { %1571 = vrcp.f32 %v666_v8  ;;  %v679_v14 = vand.u32 2147483648, %v666_v8  ;;  %vm673_vm2 = vweird.f32 %v666_v8  ;;  %v677_v15 = vand.u32 2147483647, %v666_v8 }
 0x529   :  { %1573 = vpow2.f32 %v1456_v12 }
 0x52a   :  { %v680_v18 = vor.u32 1.1754944e-38, %v679_v14  ;;  %vm678_vm4 = vcmp.eq.f32.partialorder %v677_v15, 8.507059e+37 }
 0x52e   :  { %v1572_v61 = vpop.eup %1571 }
 0x52f   :  { %v669_v10 = vmul.f32 %v1572_v61, %v666_v8  ;;  %vm674_vm1 = vweird.f32 %v1572_v61  ;;  %v1574_v16 = vpop.eup %1573 }
 0x530   :  { %vm675_vm3 = vmor %vm673_vm2, %vm674_vm1  ;;  %v667_v19 = vadd.f32 1.0, %v1574_v16 }
 0x531   :  { %v670_v11 = vsub.f32 1.0, %v669_v10 }
 0x532   :  { %1575 = vrcp.f32 %v667_v19  ;;  %v694_v28 = vand.u32 2147483648, %v667_v19  ;;  %vm688_vm6 = vweird.f32 %v667_v19  ;;  %v692_v29 = vand.u32 2147483647, %v667_v19 }
 0x533   :  { %v671_v13 = vmul.f32 %v1572_v61, %v670_v11 }
 0x534   :  { %v695_v31 = vor.u32 1.1754944e-38, %v694_v28  ;;  %vm693_vm9 = vcmp.eq.f32.partialorder %v692_v29, 8.507059e+37 }
 0x535   :  { %v672_v62 = vadd.f32 %v1572_v61, %v671_v13 }
 0x537   :  { %v676_v17 = vsel %vm675_vm3, %v1572_v61, %v672_v62 }
 0x538   :  { %v681_v21 = vsel %vm678_vm4, %v680_v18, %v676_v17  ;;  %v1576_v23 = vpop.eup %1575 }
 0x539   :  { %v684_v24 = vmul.f32 %v1576_v23, %v667_v19  ;;  %vm689_vm5 = vweird.f32 %v1576_v23  ;;  %v700_v35 = vmul.f32 %v681_v21, %v2001_v43 }
 0x53a   :  { %vm690_vm7 = vmor %vm688_vm6, %vm689_vm5 }
 0x53b   :  { %v685_v25 = vsub.f32 1.0, %v684_v24 }
 0x53d   :  { %v686_v26 = vmul.f32 %v1576_v23, %v685_v25 }
 0x53f   :  { %v687_v27 = vadd.f32 %v1576_v23, %v686_v26 }
 0x541   :  { %v691_v30 = vsel %vm690_vm7, %v1576_v23, %v687_v27 }
 0x542   :  { %v696_v33 = vsel %vm693_vm9, %v695_v31, %v691_v30 }
 0x543   :  { %v701_v38 = vmul.f32 %v696_v33, %v2005_v48  ;;  %v311_v48 = vadd.f32 %v1961_v9, %v1986_v59 }
 0x577   :  { %v705_v20 = vpop.permute.xlu2 %704 }
 0x578   :  { %v710_v22 = vmul.f32 %v705_v20, %v681_v21 }
 0x57a   :  { %714 = vrot.lane.b32.xlu1 %v710_v22, %s1874_s19 }
 0x597   :  { %v707_v32 = vpop.permute.xlu0 %706 }
 0x598   :  { %v711_v34 = vmul.f32 %v707_v32, %v696_v33 }
 0x59a   :  { %716 = vrot.lane.b32.xlu2 %v711_v34, %s1874_s19  ;;  %v2051_v34 = vld [vmem:[#allocation2] sm:$0xff] }
 0x59b   :  { %289 = vmatmul.bf16.vlgmr.msra.gmra.mxu0 %v2051_v34 }
 0x5ec   :  { %v715_v36 = vpop.permute.xlu1 %714 }
 0x5ed   :  { %v2022_v37 = vadd.f32 %v715_v36, %v700_v35  ;;  %v1495_v35 = vld [vmem:[#allocation2 + $0x8] sm:$0xff] }
 0x5ee   :  { %294 = vmatmul.bf16.gmra.mxu0 %v1495_v35 }
 0x5ef   :  { %1577 = vtanh.f32 %v2022_v37 }
 0x5f4   :  { %v717_v39 = vpop.permute.xlu2 %716 }
 0x5f5   :  { %v1578_v40 = vpop.eup %1577  ;;  %v2026_v41 = vadd.f32 %v717_v39, %v701_v38 }
 0x5f6   :  { %726 = vrot.lane.b32.xlu0 %v1578_v40, %s1874_s19 }
 0x5f7   :  { %1579 = vtanh.f32 %v2026_v41 }
 0x5fd   :  { %v1580_v42 = vpop.eup %1579 }
 0x5fe   :  { %728 = vrot.lane.b32.xlu1 %v1580_v42, %s1874_s19  ;;  %v1497_v42 = vld [vmem:[#allocation2 + $0x18] sm:$0xff] }
 0x668   :  { %v727_v44 = vpop.permute.xlu0 %726 }
 0x669   :  { %v732_v45 = vmul.f32 %v727_v44, %v681_v21 }
 0x670   :  { %v729_v43 = vpop.permute.xlu1 %728 }
 0x671   :  { %v733_v46 = vmul.f32 %v729_v43, %v696_v33  ;;  %v2058_v43 = vpop.f32.mrf.mxu0 }
 0x673   :  { %v734_v47 = vpack.c.bf16 %v733_v46, %v732_v45 }
 0x675   :  { %736 = vrot.lane.b32.xlu2 %v734_v47, %s1865_s17 }
 0x679   :  { %v2060_v45 = vpop.f32.mrf.mxu0 }
 0x681   :  { %v2062_v46 = vpop.f32.mrf.mxu0 }
 0x689   :  { %v2064_v47 = vpop.f32.mrf.mxu0 }
 0x6cf   :  { %v737_v51 = vpop.permute.xlu2 %736 }
 0x6d0   :  { %1457 = vmatmul.msk.bf16.vlgmr.msrb.gmra.mxu2 %vm535_vm8, %v737_v51 }
 0x753   :  { %v750_v52 = vpop.f32.mrf.mxu2 }
 0x754   :  { %v755_v53 = vadd.f32 %v750_v52, %v311_v48 }
 0x756   :  { %1581 = vtanh.f32 %v755_v53  ;;  %v1458_v63 = vmul.f32 -1.442695, %v755_v53 }
 0x75b   :  { %v752_v55 = vpop.f32.mrf.mxu2 }
 0x75c   :  { %v1582_v56 = vpop.eup %1581  ;;  %v756_v57 = vadd.f32 %v752_v55, %v313_v54 }
 0x75d   :  { %801 = vrot.lane.b32.xlu0 %v1582_v56, %s1874_s19 }
 0x75e   :  { %1583 = vtanh.f32 %v756_v57  ;;  %v1459_v0 = vmul.f32 -1.442695, %v756_v57 }
 0x75f   :  { %1585 = vpow2.f32 %v1458_v63 }
 0x760   :  { %1587 = vpow2.f32 %v1459_v0 }
 0x764   :  { %v1584_v58 = vpop.eup %1583 }
 0x765   :  { %803 = vrot.lane.b32.xlu1 %v1584_v58, %s1874_s19  ;;  %v1586_v1 = vpop.eup %1585 }
 0x766   :  { %v763_v59 = vadd.f32 1.0, %v1586_v1  ;;  %v1588_v2 = vpop.eup %1587 }
 0x767   :  { %v764_v3 = vadd.f32 1.0, %v1588_v2 }
 0x768   :  { %1589 = vrcp.f32 %v763_v59  ;;  %v776_v11 = vand.u32 2147483648, %v763_v59  ;;  %vm770_vm11 = vweird.f32 %v763_v59  ;;  %v774_v12 = vand.u32 2147483647, %v763_v59 }
 0x769   :  { %1591 = vrcp.f32 %v764_v3  ;;  %v791_v19 = vand.u32 2147483648, %v764_v3  ;;  %vm785_vm15 = vweird.f32 %v764_v3  ;;  %v789_v20 = vand.u32 2147483647, %v764_v3 }
 0x76a   :  { %v777_v14 = vor.u32 1.1754944e-38, %v776_v11  ;;  %vm775_vm13 = vcmp.eq.f32.partialorder %v774_v12, 8.507059e+37 }
 0x76b   :  { %v792_v22 = vor.u32 1.1754944e-38, %v791_v19  ;;  %vm790_vm1 = vcmp.eq.f32.partialorder %v789_v20, 8.507059e+37 }
 0x76e   :  { %v1590_v4 = vpop.eup %1589 }
 0x76f   :  { %v766_v60 = vmul.f32 %v1590_v4, %v763_v59  ;;  %v1592_v6 = vpop.eup %1591  ;;  %vm771_vm10 = vweird.f32 %v1590_v4 }
 0x770   :  { %v781_v8 = vmul.f32 %v1592_v6, %v764_v3  ;;  %vm772_vm12 = vmor %vm770_vm11, %vm771_vm10  ;;  %vm786_vm14 = vweird.f32 %v1592_v6 }
 0x771   :  { %v767_v5 = vsub.f32 1.0, %v766_v60  ;;  %vm787_vm0 = vmor %vm785_vm15, %vm786_vm14 }
 0x772   :  { %v782_v10 = vsub.f32 1.0, %v781_v8 }
 0x773   :  { %v768_v7 = vmul.f32 %v1590_v4, %v767_v5 }
 0x774   :  { %v783_v62 = vmul.f32 %v1592_v6, %v782_v10 }
 0x775   :  { %v769_v61 = vadd.f32 %v1590_v4, %v768_v7 }
 0x776   :  { %v784_v18 = vadd.f32 %v1592_v6, %v783_v62 }
 0x777   :  { %v773_v13 = vsel %vm772_vm12, %v1590_v4, %v769_v61 }
 0x778   :  { %v778_v16 = vsel %vm775_vm13, %v777_v14, %v773_v13  ;;  %v788_v21 = vsel %vm787_vm0, %v1592_v6, %v784_v18 }
 0x779   :  { %v793_v24 = vsel %vm790_vm1, %v792_v22, %v788_v21  ;;  %v797_v26 = vmul.f32 %v778_v16, %v2022_v37 }
 0x77a   :  { %v798_v30 = vmul.f32 %v793_v24, %v2026_v41  ;;  %v1496_v41 = vld [vmem:[#allocation2 + $0x10] sm:$0xff] }
 0x77b   :  { %299 = vmatmul.bf16.gmra.mxu0 %v1496_v41 }
 0x78b   :  { %304 = vmatmul.bf16.gmra.mxu0 %v1497_v42 }
 0x7cf   :  { %v802_v15 = vpop.permute.xlu0 %801 }
 0x7d0   :  { %v807_v17 = vmul.f32 %v802_v15, %v778_v16 }
 0x7d2   :  { %811 = vrot.lane.b32.xlu2 %v807_v17, %s1874_s19 }
 0x7d7   :  { %v804_v23 = vpop.permute.xlu1 %803 }
 0x7d8   :  { %v808_v25 = vmul.f32 %v804_v23, %v793_v24 }
 0x7da   :  { %813 = vrot.lane.b32.xlu0 %v808_v25, %s1874_s19 }
 0x7f8   :  { %v2066_v51 = vpop.f32.mrf.mxu0 }
 0x800   :  { %v2068_v48 = vpop.f32.mrf.mxu0 }
 0x808   :  { %v305_v52 = vpop.f32.mrf.mxu0 }
 0x809   :  { %v306_v53 = vadd.f32 %v1961_v9, %v305_v52 }
 0x82c   :  { %v812_v27 = vpop.permute.xlu2 %811 }
 0x82d   :  { %v2042_v28 = vadd.f32 %v812_v27, %v797_v26 }
 0x82f   :  { %1593 = vtanh.f32 %v2042_v28 }
 0x835   :  { %v1594_v29 = vpop.eup %1593 }
 0x836   :  { %823 = vrot.lane.b32.xlu1 %v1594_v29, %s1874_s19 }
 0x84c   :  { %v814_v31 = vpop.permute.xlu0 %813 }
 0x84d   :  { %v2047_v32 = vadd.f32 %v814_v31, %v798_v30 }
 0x84f   :  { %1595 = vtanh.f32 %v2047_v32 }
 0x855   :  { %v1596_v33 = vpop.eup %1595 }
 0x856   :  { %825 = vrot.lane.b32.xlu2 %v1596_v33, %s1874_s19 }
 0x8a8   :  { %v824_v36 = vpop.permute.xlu1 %823 }
 0x8a9   :  { %v829_v38 = vmul.f32 %v824_v36, %v778_v16 }
 0x8b0   :  { %v826_v37 = vpop.permute.xlu2 %825 }
 0x8b1   :  { %v830_v39 = vmul.f32 %v826_v37, %v793_v24 }
 0x8b3   :  { %v831_v40 = vpack.c.bf16 %v830_v39, %v829_v38 }
 0x8b5   :  { %833 = vrot.lane.b32.xlu0 %v831_v40, %s1865_s17 }
 0x927   :  { %v834_v44 = vpop.permute.xlu0 %833 }
 0x928   :  { %1460 = vmatmul.msk.bf16.vlgmr.msra.gmra.mxu3 %vm535_vm8, %v834_v44 }
 0x929   :  { %1135 = vmatpush.bf16.msra.mxu3 %v1970_v49  ;;  %v307_v49 = vpop.f32.mrf.mxu0 }
 0x92d   :  { %1136 = vmatpush.bf16.msra.mxu3 %v1973_v50  ;;  %v308_v50 = vadd.f32 %v1961_v9, %v307_v49 }
 0x9ab   :  { %v847_v54 = vpop.f32.mrf.mxu3 }
 0x9ac   :  { %v852_v55 = vadd.f32 %v847_v54, %v306_v53  ;;  %v303_v53 = vadd.f32 %v1961_v9, %v2068_v48 }
 0x9ae   :  { %1597 = vtanh.f32 %v852_v55  ;;  %v1461_v2 = vmul.f32 -1.442695, %v852_v55 }
 0x9b3   :  { %v849_v56 = vpop.f32.mrf.mxu3 }
 0x9b4   :  { %v1598_v57 = vpop.eup %1597  ;;  %v853_v58 = vadd.f32 %v849_v56, %v308_v50 }
 0x9b5   :  { %898 = vrot.lane.b32.xlu1 %v1598_v57, %s1874_s19 }
 0x9b6   :  { %1599 = vtanh.f32 %v853_v58  ;;  %v1462_v0 = vmul.f32 -1.442695, %v853_v58 }
 0x9b8   :  { %1601 = vpow2.f32 %v1462_v0 }
 0x9bc   :  { %v1600_v63 = vpop.eup %1599 }
 0x9bd   :  { %900 = vrot.lane.b32.xlu2 %v1600_v63, %s1874_s19 }
 0x9be   :  { %v1602_v1 = vpop.eup %1601 }
 0x9bf   :  { %v861_v59 = vadd.f32 1.0, %v1602_v1 }
 0x9c1   :  { %1603 = vrcp.f32 %v861_v59  ;;  %v888_v10 = vand.u32 2147483648, %v861_v59  ;;  %vm882_vm3 = vweird.f32 %v861_v59  ;;  %v886_v11 = vand.u32 2147483647, %v861_v59 }
 0x9c2   :  { %1605 = vpow2.f32 %v1461_v2 }
 0x9c3   :  { %v889_v62 = vor.u32 1.1754944e-38, %v888_v10  ;;  %vm887_vm5 = vcmp.eq.f32.partialorder %v886_v11, 8.507059e+37 }
 0x9c7   :  { %v1604_v3 = vpop.eup %1603 }
 0x9c8   :  { %v1606_v4 = vpop.eup %1605  ;;  %v878_v60 = vmul.f32 %v1604_v3, %v861_v59  ;;  %vm883_vm2 = vweird.f32 %v1604_v3 }
 0x9c9   :  { %v860_v5 = vadd.f32 1.0, %v1606_v4  ;;  %vm884_vm4 = vmor %vm882_vm3, %vm883_vm2 }
 0x9ca   :  { %v879_v6 = vsub.f32 1.0, %v878_v60 }
 0x9cb   :  { %1607 = vrcp.f32 %v860_v5  ;;  %v873_v20 = vand.u32 2147483648, %v860_v5  ;;  %vm867_vm7 = vweird.f32 %v860_v5  ;;  %v871_v21 = vand.u32 2147483647, %v860_v5 }
 0x9cc   :  { %v880_v7 = vmul.f32 %v1604_v3, %v879_v6 }
 0x9cd   :  { %v874_v23 = vor.u32 1.1754944e-38, %v873_v20  ;;  %vm872_vm10 = vcmp.eq.f32.partialorder %v871_v21, 8.507059e+37 }
 0x9ce   :  { %v881_v8 = vadd.f32 %v1604_v3, %v880_v7 }
 0x9d0   :  { %v885_v12 = vsel %vm884_vm4, %v1604_v3, %v881_v8 }
 0x9d1   :  { %v1608_v61 = vpop.eup %1607  ;;  %v890_v15 = vsel %vm887_vm5, %v889_v62, %v885_v12 }
 0x9d2   :  { %v863_v13 = vmul.f32 %v1608_v61, %v860_v5  ;;  %vm868_vm6 = vweird.f32 %v1608_v61  ;;  %v895_v27 = vmul.f32 %v890_v15, %v2047_v32 }
 0x9d3   :  { %vm869_vm9 = vmor %vm867_vm7, %vm868_vm6 }
 0x9d4   :  { %v864_v17 = vsub.f32 1.0, %v863_v13 }
 0x9d6   :  { %v865_v18 = vmul.f32 %v1608_v61, %v864_v17 }
 0x9d8   :  { %v866_v19 = vadd.f32 %v1608_v61, %v865_v18 }
 0x9da   :  { %v870_v22 = vsel %vm869_vm9, %v1608_v61, %v866_v19 }
 0x9db   :  { %v875_v25 = vsel %vm872_vm10, %v874_v23, %v870_v22 }
 0x9dc   :  { %v894_v33 = vmul.f32 %v875_v25, %v2042_v28  ;;  %v301_v28 = vadd.f32 %v1961_v9, %v2066_v51 }
 0xa17   :  { %v901_v14 = vpop.permute.xlu2 %900 }
 0xa18   :  { %v905_v16 = vmul.f32 %v901_v14, %v890_v15 }
 0xa1a   :  { %910 = vrot.lane.b32.xlu1 %v905_v16, %s1874_s19 }
 0xa27   :  { %v899_v24 = vpop.permute.xlu1 %898 }
 0xa28   :  { %v904_v26 = vmul.f32 %v899_v24, %v875_v25 }
 0xa2a   :  { %908 = vrot.lane.b32.xlu0 %v904_v26, %s1874_s19 }
 0xa8c   :  { %v911_v29 = vpop.permute.xlu1 %910 }
 0xa8d   :  { %v2077_v30 = vadd.f32 %v911_v29, %v895_v27 }
 0xa8f   :  { %1609 = vtanh.f32 %v2077_v30 }
 0xa95   :  { %v1610_v31 = vpop.eup %1609 }
 0xa96   :  { %922 = vrot.lane.b32.xlu0 %v1610_v31, %s1874_s19 }
 0xa9c   :  { %v909_v35 = vpop.permute.xlu0 %908 }
 0xa9d   :  { %v2082_v36 = vadd.f32 %v909_v35, %v894_v33 }
 0xa9f   :  { %1611 = vtanh.f32 %v2082_v36 }
 0xaa5   :  { %v1612_v37 = vpop.eup %1611 }
 0xaa6   :  { %920 = vrot.lane.b32.xlu2 %v1612_v37, %s1874_s19 }
 0xb00   :  { %v921_v38 = vpop.permute.xlu2 %920 }
 0xb01   :  { %v926_v39 = vmul.f32 %v921_v38, %v875_v25 }
 0xb08   :  { %v923_v32 = vpop.permute.xlu0 %922 }
 0xb09   :  { %v927_v40 = vmul.f32 %v923_v32, %v890_v15 }
 0xb0b   :  { %v928_v41 = vpack.c.bf16 %v927_v40, %v926_v39  ;;  %v298_v40 = vadd.f32 %v1961_v9, %v2064_v47 }
 0xb0d   :  { %930 = vrot.lane.b32.xlu1 %v928_v41, %s1865_s17 }
 0xb7f   :  { %v931_v42 = vpop.permute.xlu1 %930 }
 0xb80   :  { %1463 = vmatmul.msk.bf16.vlgmr.msra.gmra.mxu2 %vm535_vm8, %v931_v42 }
 0xc03   :  { %v944_v44 = vpop.f32.mrf.mxu2 }
 0xc04   :  { %v949_v52 = vadd.f32 %v944_v44, %v301_v28 }
 0xc06   :  { %1613 = vtanh.f32 %v949_v52  ;;  %v1464_v56 = vmul.f32 -1.442695, %v949_v52 }
 0xc0b   :  { %v946_v54 = vpop.f32.mrf.mxu2 }
 0xc0c   :  { %v1614_v55 = vpop.eup %1613  ;;  %v950_v49 = vadd.f32 %v946_v54, %v303_v53 }
 0xc0d   :  { %995 = vrot.lane.b32.xlu2 %v1614_v55, %s1874_s19 }
 0xc0e   :  { %1615 = vtanh.f32 %v950_v49  ;;  %v1465_v1 = vmul.f32 -1.442695, %v950_v49 }
 0xc0f   :  { %1617 = vpow2.f32 %v1464_v56 }
 0xc14   :  { %v1616_v50 = vpop.eup %1615 }
 0xc15   :  { %997 = vrot.lane.b32.xlu0 %v1616_v50, %s1874_s19  ;;  %v1618_v57 = vpop.eup %1617 }
 0xc16   :  { %v957_v58 = vadd.f32 1.0, %v1618_v57 }
 0xc18   :  { %1619 = vrcp.f32 %v957_v58  ;;  %v970_v2 = vand.u32 2147483648, %v957_v58  ;;  %vm964_vm12 = vweird.f32 %v957_v58  ;;  %v968_v3 = vand.u32 2147483647, %v957_v58 }
 0xc19   :  { %1621 = vpow2.f32 %v1465_v1 }
 0xc1a   :  { %v971_v5 = vor.u32 1.1754944e-38, %v970_v2  ;;  %vm969_vm14 = vcmp.eq.f32.partialorder %v968_v3, 8.507059e+37 }
 0xc1e   :  { %v1620_v51 = vpop.eup %1619 }
 0xc1f   :  { %v960_v63 = vmul.f32 %v1620_v51, %v957_v58  ;;  %vm965_vm11 = vweird.f32 %v1620_v51  ;;  %v1622_v4 = vpop.eup %1621 }
 0xc20   :  { %vm966_vm13 = vmor %vm964_vm12, %vm965_vm11  ;;  %v958_v6 = vadd.f32 1.0, %v1622_v4 }
 0xc21   :  { %v961_v0 = vsub.f32 1.0, %v960_v63 }
 0xc22   :  { %1623 = vrcp.f32 %v958_v6  ;;  %v985_v14 = vand.u32 2147483648, %v958_v6  ;;  %vm979_vm0 = vweird.f32 %v958_v6  ;;  %v983_v15 = vand.u32 2147483647, %v958_v6 }
 0xc23   :  { %v962_v59 = vmul.f32 %v1620_v51, %v961_v0 }
 0xc24   :  { %v986_v17 = vor.u32 1.1754944e-38, %v985_v14  ;;  %vm984_vm2 = vcmp.eq.f32.partialorder %v983_v15, 8.507059e+37 }
 0xc25   :  { %v963_v48 = vadd.f32 %v1620_v51, %v962_v59 }
 0xc27   :  { %v967_v60 = vsel %vm966_vm13, %v1620_v51, %v963_v48 }
 0xc28   :  { %v972_v8 = vsel %vm969_vm14, %v971_v5, %v967_v60  ;;  %v1624_v10 = vpop.eup %1623 }
 0xc29   :  { %v975_v11 = vmul.f32 %v1624_v10, %v958_v6  ;;  %vm980_vm15 = vweird.f32 %v1624_v10  ;;  %v991_v21 = vmul.f32 %v972_v8, %v2082_v36 }
 0xc2a   :  { %vm981_vm1 = vmor %vm979_vm0, %vm980_vm15 }
 0xc2b   :  { %v976_v12 = vsub.f32 1.0, %v975_v11 }
 0xc2d   :  { %v977_v13 = vmul.f32 %v1624_v10, %v976_v12 }
 0xc2f   :  { %v978_v62 = vadd.f32 %v1624_v10, %v977_v13 }
 0xc31   :  { %v982_v16 = vsel %vm981_vm1, %v1624_v10, %v978_v62 }
 0xc32   :  { %v987_v19 = vsel %vm984_vm2, %v986_v17, %v982_v16 }
 0xc33   :  { %v992_v24 = vmul.f32 %v987_v19, %v2077_v30  ;;  %v296_v30 = vadd.f32 %v1961_v9, %v2062_v46 }
 0xc67   :  { %v996_v7 = vpop.permute.xlu2 %995 }
 0xc68   :  { %v1001_v61 = vmul.f32 %v996_v7, %v972_v8 }
 0xc6a   :  { %1005 = vrot.lane.b32.xlu1 %v1001_v61, %s1874_s19 }
 0xc87   :  { %v998_v18 = vpop.permute.xlu0 %997 }
 0xc88   :  { %v1002_v20 = vmul.f32 %v998_v18, %v987_v19 }
 0xc8a   :  { %1007 = vrot.lane.b32.xlu2 %v1002_v20, %s1874_s19  ;;  %v1483_v20 = vld [vmem:[#allocation5 + $0x38] sm:$0xff] }
 0xc8b   :  { %381 = vmatpush.bf16.msrb.mxu1 %v1483_v20 }
 0xcdc   :  { %v1006_v22 = vpop.permute.xlu1 %1005 }
 0xcdd   :  { %v2097_v23 = vadd.f32 %v1006_v22, %v991_v21  ;;  %v1482_v21 = vld [vmem:[#allocation5 + $0x30] sm:$0xff]  ;;  %v1481_v22 = vld [vmem:[#allocation5 + $0x28] sm:$0xff] }
 0xcde   :  { %382 = vmatpush.bf16.msrb.mxu1 %v1482_v21 }
 0xcdf   :  { %1625 = vtanh.f32 %v2097_v23 }
 0xce2   :  { %383 = vmatpush.bf16.msrb.mxu1 %v1481_v22 }
 0xce4   :  { %v1008_v25 = vpop.permute.xlu2 %1007 }
 0xce5   :  { %v1626_v26 = vpop.eup %1625  ;;  %v2101_v27 = vadd.f32 %v1008_v25, %v992_v24  ;;  %v1479_v24 = vld [vmem:[#allocation5 + $0x18] sm:$0xff]  ;;  %v1478_v25 = vld [vmem:[#allocation5 + $0x10] sm:$0xff] }
 0xce6   :  { %1017 = vrot.lane.b32.xlu0 %v1626_v26, %s1874_s19  ;;  %v1477_v26 = vld [vmem:[#allocation5 + $0x8] sm:$0xff] }
 0xce7   :  { %1627 = vtanh.f32 %v2101_v27 }
 0xced   :  { %v1628_v29 = vpop.eup %1627 }
 0xcee   :  { %1019 = vrot.lane.b32.xlu1 %v1628_v29, %s1874_s19  ;;  %v1476_v29 = vld [vmem:[#allocation5] sm:$0xff] }
 0xd58   :  { %v1018_v31 = vpop.permute.xlu0 %1017 }
 0xd59   :  { %v1023_v35 = vmul.f32 %v1018_v31, %v972_v8 }
 0xd60   :  { %v1020_v33 = vpop.permute.xlu1 %1019 }
 0xd61   :  { %v1024_v36 = vmul.f32 %v1020_v33, %v987_v19 }
 0xd63   :  { %v1025_v37 = vpack.c.bf16 %v1024_v36, %v1023_v35 }
 0xd65   :  { %1027 = vrot.lane.b32.xlu2 %v1025_v37, %s1865_s17 }
 0xdbf   :  { %v1028_v38 = vpop.permute.xlu2 %1027 }
 0xdc0   :  { %1466 = vmatmul.msk.bf16.vlgmr.msrb.gmra.mxu3 %vm535_vm8, %v1028_v38  ;;  %v1531_v38 = vld [vmem:[%s2183_s2] ss:$0 sm:$0xff] }
 0xe43   :  { %v1041_v32 = vpop.f32.mrf.mxu3 }
 0xe44   :  { %v1046_v39 = vadd.f32 %v1041_v32, %v296_v30 }
 0xe46   :  { %1629 = vtanh.f32 %v1046_v39  ;;  %v1467_v52 = vmul.f32 -1.442695, %v1046_v39 }
 0xe4b   :  { %v1043_v41 = vpop.f32.mrf.mxu3 }
 0xe4c   :  { %v1630_v42 = vpop.eup %1629  ;;  %v1047_v28 = vadd.f32 %v1043_v41, %v298_v40  ;;  %v1685_v40 = vld [vmem:[%s2186_s5] ss:$0 sm:$0xff] }
 0xe4d   :  { %1092 = vrot.lane.b32.xlu0 %v1630_v42, %s1874_s19  ;;  %v291_v41 = vadd.f32 %v1685_v40, %v2058_v43 }
 0xe4e   :  { %1631 = vtanh.f32 %v1047_v28  ;;  %v1468_v53 = vmul.f32 -1.442695, %v1047_v28  ;;  %v293_v28 = vadd.f32 %v1685_v40, %v2060_v45 }
 0xe4f   :  { %1633 = vpow2.f32 %v1467_v52 }
 0xe50   :  { %1635 = vpow2.f32 %v1468_v53 }
 0xe54   :  { %v1632_v44 = vpop.eup %1631 }
 0xe55   :  { %1094 = vrot.lane.b32.xlu1 %v1632_v44, %s1874_s19  ;;  %v1634_v54 = vpop.eup %1633 }
 0xe56   :  { %v1054_v46 = vadd.f32 1.0, %v1634_v54  ;;  %v1636_v55 = vpop.eup %1635 }
 0xe57   :  { %v1055_v49 = vadd.f32 1.0, %v1636_v55 }
 0xe58   :  { %1637 = vrcp.f32 %v1054_v46  ;;  %v1067_v0 = vand.u32 2147483648, %v1054_v46  ;;  %vm1061_vm4 = vweird.f32 %v1054_v46  ;;  %v1065_v1 = vand.u32 2147483647, %v1054_v46 }
 0xe59   :  { %1639 = vrcp.f32 %v1055_v49  ;;  %v1082_v6 = vand.u32 2147483648, %v1055_v49  ;;  %vm1076_vm9 = vweird.f32 %v1055_v49  ;;  %v1080_v7 = vand.u32 2147483647, %v1055_v49 }
 0xe5a   :  { %v1068_v2 = vor.u32 1.1754944e-38, %v1067_v0  ;;  %vm1066_vm6 = vcmp.eq.f32.partialorder %v1065_v1, 8.507059e+37 }
 0xe5b   :  { %v1083_v61 = vor.u32 1.1754944e-38, %v1082_v6  ;;  %vm1081_vm11 = vcmp.eq.f32.partialorder %v1080_v7, 8.507059e+37 }
 0xe5e   :  { %v1638_v50 = vpop.eup %1637 }
 0xe5f   :  { %v1057_v9 = vmul.f32 %v1638_v50, %v1054_v46  ;;  %v1640_v56 = vpop.eup %1639  ;;  %vm1062_vm3 = vweird.f32 %v1638_v50 }
 0xe60   :  { %v1072_v58 = vmul.f32 %v1640_v56, %v1055_v49  ;;  %vm1063_vm5 = vmor %vm1061_vm4, %vm1062_vm3  ;;  %vm1077_vm7 = vweird.f32 %v1640_v56 }
 0xe61   :  { %v1058_v47 = vsub.f32 1.0, %v1057_v9  ;;  %vm1078_vm10 = vmor %vm1076_vm9, %vm1077_vm7 }
 0xe62   :  { %v1073_v63 = vsub.f32 1.0, %v1072_v58 }
 0xe63   :  { %v1059_v57 = vmul.f32 %v1638_v50, %v1058_v47 }
 0xe64   :  { %v1074_v48 = vmul.f32 %v1640_v56, %v1073_v63 }
 0xe65   :  { %v1060_v51 = vadd.f32 %v1638_v50, %v1059_v57 }
 0xe66   :  { %v1075_v5 = vadd.f32 %v1640_v56, %v1074_v48 }
 0xe67   :  { %v1064_v59 = vsel %vm1063_vm5, %v1638_v50, %v1060_v51 }
 0xe68   :  { %v1069_v4 = vsel %vm1066_vm6, %v1068_v2, %v1064_v59  ;;  %v1079_v8 = vsel %vm1078_vm10, %v1640_v56, %v1075_v5 }
 0xe69   :  { %v1084_v11 = vsel %vm1081_vm11, %v1083_v61, %v1079_v8  ;;  %v1088_v13 = vmul.f32 %v1069_v4, %v2097_v23  ;;  %v1480_v23 = vld [vmem:[#allocation5 + $0x20] sm:$0xff] }
 0xe6a   :  { %v1089_v16 = vmul.f32 %v1084_v11, %v2101_v27  ;;  %384 = vmatpush.bf16.msrb.mxu1 %v1480_v23 }
 0xe6e   :  { %385 = vmatpush.bf16.msrb.mxu1 %v1479_v24 }
 0xe72   :  { %386 = vmatpush.bf16.msrb.mxu1 %v1478_v25 }
 0xe76   :  { %387 = vmatpush.bf16.msrb.mxu1 %v1477_v26 }
 0xe7a   :  { %388 = vmatpush.bf16.msrb.mxu1 %v1476_v29 }
 0xe7d   :  { %389 = vmatmul.bf16.vlgmr.msrb.gmra.mxu1 %v2051_v34 }
 0xebf   :  { %v1093_v3 = vpop.permute.xlu0 %1092 }
 0xec0   :  { %v1098_v60 = vmul.f32 %v1093_v3, %v1069_v4 }
 0xec2   :  { %1102 = vrot.lane.b32.xlu2 %v1098_v60, %s1874_s19 }
 0xec7   :  { %v1095_v10 = vpop.permute.xlu1 %1094 }
 0xec8   :  { %v1099_v12 = vmul.f32 %v1095_v10, %v1084_v11 }
 0xeca   :  { %1104 = vrot.lane.b32.xlu0 %v1099_v12, %s1874_s19 }
 0xefa   :  { %v390_v30 = vpop.f32.mrf.mxu1 }
 0xefb   :  { %v391_v32 = vadd.f32 %v1531_v38, %v390_v30 }
 0xefd   :  { %v1439_v45 = vmul.f32 -1.442695, %v391_v32 }
 0xf02   :  { %v392_v54 = vpop.f32.mrf.mxu1 }
 0xf03   :  { %v393_v46 = vadd.f32 %v1531_v38, %v392_v54 }
 0xf05   :  { %v1440_v50 = vmul.f32 -1.442695, %v393_v46 }
 0xf1c   :  { %v1103_v62 = vpop.permute.xlu2 %1102 }
 0xf1d   :  { %v2117_v14 = vadd.f32 %v1103_v62, %v1088_v13 }
 0xf1f   :  { %1641 = vtanh.f32 %v2117_v14 }
 0xf25   :  { %v1642_v15 = vpop.eup %1641 }
 0xf26   :  { %1114 = vrot.lane.b32.xlu1 %v1642_v15, %s1874_s19 }
 0xf3c   :  { %v1105_v17 = vpop.permute.xlu0 %1104 }
 0xf3d   :  { %v2122_v18 = vadd.f32 %v1105_v17, %v1089_v16 }
 0xf3f   :  { %1643 = vtanh.f32 %v2122_v18 }
 0xf40   :  { %1645 = vtanh.f32 %v391_v32 }
 0xf45   :  { %v1644_v19 = vpop.eup %1643 }
 0xf46   :  { %1116 = vrot.lane.b32.xlu2 %v1644_v19, %s1874_s19  ;;  %v1646_v39 = vpop.eup %1645 }
 0xf98   :  { %v1115_v27 = vpop.permute.xlu1 %1114 }
 0xf99   :  { %v1120_v33 = vmul.f32 %v1115_v27, %v1069_v4 }
 0xfa0   :  { %v1117_v31 = vpop.permute.xlu2 %1116 }
 0xfa1   :  { %v1121_v35 = vmul.f32 %v1117_v31, %v1084_v11 }
 0xfa3   :  { %v1122_v36 = vpack.c.bf16 %v1121_v35, %v1120_v33 }
 0xfa5   :  { %1124 = vrot.lane.b32.xlu0 %v1122_v36, %s1865_s17 }
 0xfad   :  { %437 = vrot.lane.b32.xlu0 %v1646_v39, %s1874_s19 }
0x1017   :  { %v1125_v37 = vpop.permute.xlu0 %1124 }
0x1018   :  { %1469 = vmatmul.msk.bf16.vlgmr.msra.gmra.mxu3 %vm535_vm8, %v1125_v37 }
0x109b   :  { %v1138_v34 = vpop.f32.mrf.mxu3 }
0x109c   :  { %v1143_v42 = vadd.f32 %v1138_v34, %v291_v41 }
0x109e   :  { %1647 = vtanh.f32 %v1143_v42  ;;  %v1470_v56 = vmul.f32 -1.442695, %v1143_v42  ;;  %v438_v42 = vpop.permute.xlu0 %437 }
0x10a3   :  { %v1140_v44 = vpop.f32.mrf.mxu3 }
0x10a4   :  { %v1648_v52 = vpop.eup %1647  ;;  %v1144_v53 = vadd.f32 %v1140_v44, %v293_v28 }
0x10a5   :  { %1189 = vrot.lane.b32.xlu1 %v1648_v52, %s1874_s19 }
0x10a6   :  { %1649 = vtanh.f32 %v1144_v53  ;;  %v1471_v43 = vmul.f32 -1.442695, %v1144_v53 }
0x10a7   :  { %1651 = vtanh.f32 %v393_v46 }
0x10a8   :  { %1653 = vpow2.f32 %v1471_v43 }
0x10a9   :  { %1655 = vpow2.f32 %v1440_v50 }
0x10aa   :  { %1657 = vpow2.f32 %v1439_v45 }
0x10ac   :  { %v1650_v55 = vpop.eup %1649 }
0x10ad   :  { %1191 = vrot.lane.b32.xlu2 %v1650_v55, %s1874_s19  ;;  %v1652_v49 = vpop.eup %1651 }
0x10ae   :  { %v1654_v9 = vpop.eup %1653 }
0x10af   :  { %v1152_v47 = vadd.f32 1.0, %v1654_v9  ;;  %v1656_v57 = vpop.eup %1655 }
0x10b0   :  { %v402_v58 = vadd.f32 1.0, %v1656_v57  ;;  %v1658_v51 = vpop.eup %1657 }
0x10b1   :  { %1659 = vrcp.f32 %v1152_v47  ;;  %v401_v1 = vadd.f32 1.0, %v1658_v51  ;;  %v1179_v61 = vand.u32 2147483648, %v1152_v47  ;;  %vm1173_vm13 = vweird.f32 %v1152_v47 }
0x10b2   :  { %1661 = vpow2.f32 %v1470_v56  ;;  %v1177_v11 = vand.u32 2147483647, %v1152_v47  ;;  %vm423_vm0 = vweird.f32 %v402_v58  ;;  %v429_v20 = vand.u32 2147483648, %v402_v58 }
0x10b3   :  { %1663 = vrcp.f32 %v402_v58  ;;  %v1180_v15 = vor.u32 1.1754944e-38, %v1179_v61  ;;  %v427_v23 = vand.u32 2147483647, %v402_v58  ;;  %vm408_vm3 = vweird.f32 %v401_v1 }
0x10b4   :  { %1665 = vrcp.f32 %v401_v1  ;;  %vm1178_vm15 = vcmp.eq.f32.partialorder %v1177_v11, 8.507059e+37  ;;  %v430_v26 = vor.u32 1.1754944e-38, %v429_v20  ;;  %v414_v27 = vand.u32 2147483648, %v401_v1 }
0x10b5   :  { %439 = vrot.lane.b32.xlu2 %v1652_v49, %s1874_s19  ;;  %vm428_vm5 = vcmp.eq.f32.partialorder %v427_v23, 8.507059e+37  ;;  %v412_v35 = vand.u32 2147483647, %v401_v1 }
0x10b6   :  { %v415_v30 = vor.u32 1.1754944e-38, %v414_v27 }
0x10b7   :  { %v1660_v63 = vpop.eup %1659  ;;  %vm413_vm9 = vcmp.eq.f32.partialorder %v412_v35, 8.507059e+37 }
0x10b8   :  { %v1662_v0 = vpop.eup %1661  ;;  %v1169_v59 = vmul.f32 %v1660_v63, %v1152_v47  ;;  %vm1174_vm12 = vweird.f32 %v1660_v63 }
0x10b9   :  { %v1151_v48 = vadd.f32 1.0, %v1662_v0  ;;  %v1664_v3 = vpop.eup %1663  ;;  %vm1175_vm14 = vmor %vm1173_vm13, %vm1174_vm12 }
0x10ba   :  { %v1170_v2 = vsub.f32 1.0, %v1169_v59  ;;  %v419_v60 = vmul.f32 %v1664_v3, %v402_v58  ;;  %v1666_v5 = vpop.eup %1665  ;;  %vm424_vm1 = vweird.f32 %v1664_v3  ;;  %v1220_v59 = vld [vmem:[#allocation10 + $0x8] sm:$0xff] }
0x10bb   :  { %1667 = vrcp.f32 %v1151_v48  ;;  %v404_v10 = vmul.f32 %v1666_v5, %v401_v1  ;;  %vm425_vm2 = vmor %vm423_vm0, %vm424_vm1  ;;  %vm409_vm4 = vweird.f32 %v1666_v5  ;;  %v1164_v41 = vand.u32 2147483648, %v1151_v48  ;;  %v1222_v1 = vld [vmem:[#allocation10 + $0x18] sm:$0xff] }
0x10bc   :  { %v1171_v4 = vmul.f32 %v1660_v63, %v1170_v2  ;;  %v420_v7 = vsub.f32 1.0, %v419_v60  ;;  %vm2145_vm6 = vmor %vm408_vm3, %vm409_vm4  ;;  %vm1158_vm10 = vweird.f32 %v1151_v48  ;;  %v1162_v34 = vand.u32 2147483647, %v1151_v48  ;;  %1282 = vmatpush.msrb.mxu3 %v1222_v1  ;;  %v1226_v2 = vld [vmem:[#allocation11 + $0x18] sm:$0xff] }
0x10bd   :  { %v405_v16 = vsub.f32 1.0, %v404_v10  ;;  %v1165_v52 = vor.u32 1.1754944e-38, %v1164_v41  ;;  %1249 = vmatpush.msrb.mxu2 %v1226_v2 }
0x10be   :  { %v1172_v6 = vadd.f32 %v1660_v63, %v1171_v4  ;;  %v421_v13 = vmul.f32 %v1664_v3, %v420_v7  ;;  %vm1163_vm12 = vcmp.eq.f32.partialorder %v1162_v34, 8.507059e+37  ;;  %v1223_v4 = vld [vmem:[#allocation11] sm:$0xff] }
0x10bf   :  { %v406_v25 = vmul.f32 %v1666_v5, %v405_v16 }
0x10c0   :  { %v1176_v12 = vsel %vm1175_vm14, %v1660_v63, %v1172_v6  ;;  %v422_v22 = vadd.f32 %v1664_v3, %v421_v13 }
0x10c1   :  { %v1668_v8 = vpop.eup %1667  ;;  %v2141_v19 = vsel %vm1178_vm15, %v1180_v15, %v1176_v12  ;;  %v407_v33 = vadd.f32 %v1666_v5, %v406_v25 }
0x10c2   :  { %v1154_v62 = vmul.f32 %v1668_v8, %v1151_v48  ;;  %v426_v29 = vsel %vm425_vm2, %v1664_v3, %v422_v22  ;;  %vm1159_vm7 = vweird.f32 %v1668_v8  ;;  %v1186_v50 = vmul.f32 %v2141_v19, %v2122_v18  ;;  %v1221_v18 = vld [vmem:[#allocation10 + $0x10] sm:$0xff]  ;;  %v1219_v48 = vld [vmem:[#allocation10] sm:$0xff]  ;;  %v1224_v3 = vld [vmem:[#allocation11 + $0x8] sm:$0xff] }
0x10c3   :  { %v2149_v38 = vsel %vm428_vm5, %v430_v26, %v426_v29  ;;  %v411_v40 = vsel %vm2145_vm6, %v1666_v5, %v407_v33  ;;  %vm1160_vm11 = vmor %vm1158_vm10, %vm1159_vm7  ;;  %1283 = vmatpush.msrb.mxu3 %v1221_v18 }
0x10c4   :  { %v1155_v24 = vsub.f32 1.0, %v1154_v62  ;;  %v416_v28 = vsel %vm413_vm9, %v415_v30, %v411_v40  ;;  %v1532_v62 = vld [vmem:[%s2189_s8] ss:$0 sm:$0xff]  ;;  %s1875_s8 = smov [#allocation13]  }
0x10c5   :  { %v443_v53 = vmul.f32 %v438_v42, %v416_v28  ;;  %1284 = vmatpush.msrb.mxu3 %v1220_v59 }
0x10c6   :  { %v1156_v31 = vmul.f32 %v1668_v8, %v1155_v24 }
0x10c7   :  { %1285 = vmatpush.msrb.mxu3 %v1219_v48 }
0x10c8   :  { %v1157_v39 = vadd.f32 %v1668_v8, %v1156_v31 }
0x10ca   :  { %v1161_v44 = vsel %vm1160_vm11, %v1668_v8, %v1157_v39 }
0x10cb   :  { %v1166_v46 = vsel %vm1163_vm12, %v1165_v52, %v1161_v44 }
0x10cc   :  { %v1185_v56 = vmul.f32 %v1166_v46, %v2117_v14  ;;  %v1225_v14 = vld [vmem:[#allocation11 + $0x10] sm:$0xff] }
0x10cd   :  { %1250 = vmatpush.msrb.mxu2 %v1225_v14 }
0x10cf   :  { %1251 = vmatpush.msrb.mxu2 %v1224_v3 }
0x10d1   :  { %1252 = vmatpush.msrb.mxu2 %v1223_v4 }
0x1107   :  { %v1192_v17 = vpop.permute.xlu2 %1191 }
0x1108   :  { %v1196_v21 = vmul.f32 %v1192_v17, %v2141_v19 }
0x110a   :  { %1201 = vrot.lane.b32.xlu0 %v1196_v21, %s1874_s19 }
0x110f   :  { %v440_v37 = vpop.permute.xlu2 %439 }
0x1110   :  { %v444_v32 = vmul.f32 %v440_v37, %v2149_v38 }
0x1112   :  { %1669 = vtanh.f32 %v444_v32 }
0x1113   :  { %1671 = vtanh.f32 %v443_v53 }
0x1117   :  { %v1190_v54 = vpop.permute.xlu1 %1189 }
0x1118   :  { %v1670_v55 = vpop.eup %1669  ;;  %v1195_v49 = vmul.f32 %v1190_v54, %v1166_v46 }
0x1119   :  { %451 = vrot.lane.b32.xlu0 %v1670_v55, %s1865_s17  ;;  %v1672_v43 = vpop.eup %1671 }
0x111a   :  { %1199 = vrot.lane.b32.xlu1 %v1195_v49, %s1874_s19 }
0x1122   :  { %449 = vrot.lane.b32.xlu1 %v1672_v43, %s1865_s17 }
0x117c   :  { %v1202_v9 = vpop.permute.xlu0 %1201 }
0x117d   :  { %v1206_v45 = vadd.f32 %v1202_v9, %v1186_v50 }
0x117f   :  { %1673 = vtanh.f32 %v1206_v45 }
0x1185   :  { %v1674_v47 = vpop.eup %1673 }
0x1186   :  { %1213 = vrot.lane.b32.xlu1 %v1674_v47, %s1874_s19 }
0x118b   :  { %v452_v6 = vpop.permute.xlu0 %451 }
0x118c   :  { %v1200_v57 = vpop.permute.xlu1 %1199  ;;  %v456_v8 = vmul.f32 %v452_v6, %v2149_v38 }
0x118d   :  { %v1205_v58 = vadd.f32 %v1200_v57, %v1185_v56 }
0x118f   :  { %1675 = vtanh.f32 %v1205_v58 }
0x1194   :  { %v450_v51 = vpop.permute.xlu1 %449 }
0x1195   :  { %v1676_v63 = vpop.eup %1675  ;;  %v455_v0 = vmul.f32 %v450_v51, %v416_v28 }
0x1196   :  { %1211 = vrot.lane.b32.xlu2 %v1676_v63, %s1874_s19 }
0x1197   :  { %1262 = vrot.lane.b32.xlu0 %v455_v0, %s1865_s17 }
0x11f0   :  { %v1212_v60 = vpop.permute.xlu2 %1211 }
0x11f1   :  { %v1217_v5 = vmul.f32 %v1212_v60, %v1166_v46 }
0x11f3   :  { %1229 = vrot.lane.b32.xlu2 %v1217_v5, %s1865_s17 }
0x11f8   :  { %v1214_v7 = vpop.permute.xlu1 %1213 }
0x11f9   :  { %v1218_v61 = vmul.f32 %v1214_v7, %v2141_v19 }
0x11fb   :  { %1264 = vrot.lane.b32.xlu2 %v456_v8, %s1865_s17  ;;  %1231 = vrot.lane.b32.xlu1 %v1218_v61, %s1865_s17  ;;  %s1325_s17 = sshll.u32 %s1875_s8, 4  ;;  %s1326_s17 = int_to_ptr.vmem [resolvable:$true] %s1325_s17 }
0x1209   :  { %v1263_v10 = vpop.permute.xlu0 %1262 }
0x120a   :  { %1474 = vmatmul.msk.f32.vlgmr.msrb.gmra.mxu3 %vm535_vm8, %v1263_v10 }
0x124d   :  { %v1230_v11 = vpop.permute.xlu2 %1229 }
0x124e   :  { %1472 = vmatmul.msk.f32.vlgmr.msrb.gmra.mxu2 %vm535_vm8, %v1230_v11 }
0x1255   :  { %v1265_v12 = vpop.permute.xlu2 %1264 }
0x1256   :  { %1475 = vmatmul.msk.f32.gmra.mxu3 %vm535_vm8, %v1265_v12 }
0x126d   :  { %v1232_v13 = vpop.permute.xlu1 %1231 }
0x126e   :  { %1473 = vmatmul.msk.f32.gmra.mxu2 %vm535_vm8, %v1232_v13 }
0x128d   :  { %v1287_v15 = vpop.f32.mrf.mxu3 }
0x12d1   :  { %v1254_v16 = vpop.f32.mrf.mxu2 }
0x12d2   :  { %v1288_v17 = vadd.f32 %v1287_v15, %v1254_v16 }
0x12d4   :  { %v1297_v19 = vadd.f32 %v1532_v62, %v1288_v17 }
0x12d6   :  { %1299 = vmax.xlane.f32.xlu0 %v1297_v19 }
0x12d9   :  { %v1290_v20 = vpop.f32.mrf.mxu3 }
0x12f1   :  { %v1257_v21 = vpop.f32.mrf.mxu2 }
0x12f2   :  { %v1291_v22 = vadd.f32 %v1290_v20, %v1257_v21 }
0x12f4   :  { %v1298_v23 = vadd.f32 %v1532_v62, %v1291_v22 }
0x12f6   :  { %1301 = vmax.xlane.f32.xlu1 %v1298_v23 }
0x1349   :  { %v1300_v24 = vpop.xlane.xlu0 %1299 }
0x134a   :  { %v1303_v25 = vsub.f32 %v1297_v19, %v1300_v24 }
0x134c   :  { %v1305_v26 = vmul.f32 1.442695, %v1303_v25 }
0x134e   :  { %1677 = vpow2.f32 %v1305_v26 }
0x1354   :  { %v1678_v27 = vpop.eup %1677 }
0x1355   :  { %1309 = vadd.xlane.f32.xlu2 %v1678_v27 }
0x1369   :  { %v1302_v29 = vpop.xlane.xlu1 %1301 }
0x136a   :  { %v1304_v31 = vsub.f32 %v1298_v23, %v1302_v29 }
0x136c   :  { %v1307_v33 = vmul.f32 1.442695, %v1304_v31 }
0x136e   :  { %1679 = vpow2.f32 %v1307_v33 }
0x1374   :  { %v1680_v35 = vpop.eup %1679 }
0x1375   :  { %1311 = vadd.xlane.f32.xlu2 %v1680_v35 }
0x13c8   :  { %v1310_v36 = vpop.xlane.xlu2 %1309 }
0x13c9   :  { %1681 = vlog2.f32 %v1310_v36 }
0x13cf   :  { %v1682_v37 = vpop.eup %1681 }
0x13d0   :  { %v1314_v38 = vmul.f32 0.6931472, %v1682_v37 }
0x13d2   :  { %v1317_v30 = vsub.f32 %v1303_v25, %v1314_v38 }
0x13d4   :  { %1319 = vst [vmem:[#allocation13] sm:$0xff] %v1317_v30 }
0x13e8   :  { %v1312_v32 = vpop.xlane.xlu2 %1311 }
0x13e9   :  { %1683 = vlog2.f32 %v1312_v32 }
0x13ef   :  { %v1684_v39 = vpop.eup %1683 }
0x13f0   :  { %v1316_v40 = vmul.f32 0.6931472, %v1684_v39 }
0x13f2   :  { %v1318_v41 = vsub.f32 %v1304_v31, %v1316_v40 }
0x13f4   :  { %1320 = vst [vmem:[#allocation13 + $0x8] sm:$0xff] %v1318_v41 }
0x13f5   :  { %1333 = dma.vmem_to_hbm [thread:$0]  %s1326_s17, 256, %s1328_s4, [#allocation4], %s1871_s14, %s1871_s14, %s1872_s15  }
0x13f6   :  { %1862 = dma.done.wait [#allocation4], 256  }
0x13f7   :  { %1863 = vsyncadd [#allocation4], 4294967040 }
0x13f8   :  { %1338 = vsyncpa [#allocation3], 1 }
0x13f9   :  { %1339 = vsyncpa [#allocation6], 1 }
0x13fa   :  { %1340 = vsyncpa [#allocation9], 1 }
0x13fb   :  { %1341 = vsyncpa [#allocation12], 1 }
0x13fc   :  { %1342 = vsyncpa [#allocation4], 1 }

</bundles_post_ra>
